<compile_context>
chip_gen: v7x
topology: tpu7x:2x2x1
jax: 0.10.0
libtpu: 0.0.40
codegen_flags: <defaults>
</compile_context>

<pallas_src>
import functools
import math

import jax
import jax.numpy as jnp
from jax.experimental import pallas as pl
from jax.experimental.pallas import tpu as pltpu


# ----------------------------- small math helpers (usable in-kernel) --------

def _silu(x):
    return x * jax.nn.sigmoid(x)


def _gelu_tanh(x):
    # nn.GELU(approximate='tanh')
    return 0.5 * x * (1.0 + jnp.tanh(jnp.sqrt(2.0 / jnp.pi) * (x + 0.044715 * x * x * x)))


def _layernorm(x, eps=1e-6):
    # LayerNorm(elementwise_affine=False), biased variance, over last dim.
    m = jnp.mean(x, axis=-1, keepdims=True)
    v = jnp.mean((x - m) ** 2, axis=-1, keepdims=True)
    return (x - m) * jax.lax.rsqrt(v + eps)


def _round_up(x, m):
    return (x + m - 1) // m * m


# ----------------------------- Pallas kernels -------------------------------

def _cond_kernel(tf_ref, w1_ref, b1_ref, w2_ref, b2_ref, wada_ref, bada_ref, o_ref):
    # TimestepEmbedder MLP + ALL adaLN modulation projections fused:
    #   h = SiLU(tf @ w1 + b1); c = h @ w2 + b2; mod = SiLU(c) @ W_ada_all + b_ada_all
    h = jnp.dot(tf_ref[...], w1_ref[...], preferred_element_type=jnp.float32) + b1_ref[...]
    c = jnp.dot(_silu(h), w2_ref[...], preferred_element_type=jnp.float32) + b2_ref[...]
    o_ref[...] = (jnp.dot(_silu(c), wada_ref[...], preferred_element_type=jnp.float32)
                  + bada_ref[...])


def _dit_fused_kernel(xp_ref, wp_ref, pe_ref, modb_ref, modf_ref,
                      wqkv_ref, wo_ref, w1_ref, w2_ref, bias_ref,
                      wf_ref, bf_ref, o_ref, acc_ref,
                      *, num_heads, bias_seg):
    l = pl.program_id(1)
    n_layers = pl.num_programs(1)

    BT, N, C = acc_ref.shape
    H = num_heads
    Dh = C // H
    inv_sqrt_d = 1.0 / math.sqrt(Dh)
    bf16 = jnp.bfloat16

    def bias(name):
        s, w = bias_seg[name]             # static, 128-aligned start
        return bias_ref[0, :, s:s + w]    # (1, w) f32

    # ---- patch embed + absolute PE (layer step 0 of each batch tile) ----
    @pl.when(l == 0)
    def _():
        xpf = xp_ref[...].reshape(BT * N, xp_ref.shape[-1])          # bf16, lane-padded K
        y = jnp.dot(xpf, wp_ref[...], preferred_element_type=jnp.float32)
        acc_ref[...] = y.reshape(BT, N, C) + pe_ref[...][None]       # PE already holds b_patch

    x = acc_ref[...]                                                 # (BT, N, C) f32 residual

    # ---- this layer's adaLN chunks (precomputed by the conditioning kernel) ----
    mod = modb_ref[:, 0]                                             # (BT, 6, C)
    shift_msa = mod[:, 0][:, None, :]
    scale_msa = mod[:, 1][:, None, :]
    gate_msa = mod[:, 2][:, None, :]
    shift_mlp = mod[:, 3][:, None, :]
    scale_mlp = mod[:, 4][:, None, :]
    gate_mlp = mod[:, 5][:, None, :]

    # ---- attention branch ----
    x1 = _layernorm(x) * (1.0 + scale_msa) + shift_msa
    x1f = x1.reshape(BT * N, C).astype(bf16)

    # Fused QKV projection: one full-width (BT*N, C) x (C, 3C) MXU matmul.
    qkv = jnp.dot(x1f, wqkv_ref[0], preferred_element_type=jnp.float32) + bias("b_qkv")
    qkv = qkv.reshape(BT, N, 3 * C)

    # TODO(synk): at real head counts (H=16) switch this static unroll to a
    # lax.fori_loop over stacked per-head views to bound vreg live ranges.
    heads = []
    for h in range(H):
        qh = (qkv[:, :, h * Dh:(h + 1) * Dh] * inv_sqrt_d).astype(bf16)          # (BT,N,Dh)
        kh = qkv[:, :, C + h * Dh:C + (h + 1) * Dh].astype(bf16)
        vh = qkv[:, :, 2 * C + h * Dh:2 * C + (h + 1) * Dh].astype(bf16)
        s = jnp.einsum("bnd,bmd->bnm", qh, kh, preferred_element_type=jnp.float32)
        s = s - jnp.max(s, axis=-1, keepdims=True)
        p = jnp.exp(s)
        p = p * pl.reciprocal(jnp.sum(p, axis=-1, keepdims=True), approx=True)
        heads.append(jnp.einsum("bnm,bmd->bnd", p.astype(bf16), vh,
                                preferred_element_type=jnp.float32))

    # Head-concat + ONE full-width output projection (no per-head accumulation).
    o_heads = jnp.concatenate(heads, axis=-1).reshape(BT * N, C).astype(bf16)
    att = jnp.dot(o_heads, wo_ref[0], preferred_element_type=jnp.float32) + bias("b_out")
    x = x + gate_msa * att.reshape(BT, N, C)

    # ---- MLP branch ----
    x2 = _layernorm(x) * (1.0 + scale_mlp) + shift_mlp
    x2f = x2.reshape(BT * N, C).astype(bf16)
    hmid = jnp.dot(x2f, w1_ref[0], preferred_element_type=jnp.float32) + bias("b_fc1")
    hmid = _gelu_tanh(hmid).astype(bf16)
    mlp = jnp.dot(hmid, w2_ref[0], preferred_element_type=jnp.float32) + bias("b_fc2")
    x = x + gate_mlp * mlp.reshape(BT, N, C)

    acc_ref[...] = x

    # ---- FinalLayer (last layer step): lane-dense padded (BT*N, doutp) store ----
    @pl.when(l == n_layers - 1)
    def _():
        # PyTorch FinalLayer calls modulate(x, shift, scale) with modulate(x, scale,
        # shift) semantics => x * (1 + chunk0) + chunk1 (faithful to the module).
        c0 = modf_ref[:, 0][:, None, :]
        c1 = modf_ref[:, 1][:, None, :]
        xm = _layernorm(x) * (1.0 + c0) + c1
        xmf = xm.reshape(BT * N, C).astype(bf16)
        o_ref[...] = (jnp.dot(xmf, wf_ref[...], preferred_element_type=jnp.float32)
                      + bf_ref[...])


# ----------------------------- pallas_call wrappers --------------------------

def cond_call(tf, t_w1, t_b1, t_w2, t_b2, w_ada_all, b_ada_all):
    B = tf.shape[0]
    M = w_ada_all.shape[1]
    vmem = pl.BlockSpec(memory_space=pltpu.MemorySpace.VMEM)
    return pl.pallas_call(
        _cond_kernel,
        out_shape=jax.ShapeDtypeStruct((B, M), jnp.float32),
        in_specs=[vmem] * 7,
        out_specs=vmem,
    )(tf, t_w1, t_b1, t_w2, t_b2, w_ada_all, b_ada_all)


def dit_fused_call(xp, pe_pb, mod_blk, mod_fin, prep, *, num_heads, batch_tile):
    B, N, Kp = xp.shape
    C = pe_pb.shape[-1]
    L = prep["n_layers"]
    Hm = prep["hidden"]
    doutp = prep["doutp"]
    Wb = prep["bias_width"]
    bt = batch_tile
    assert B % bt == 0, (B, bt)
    nbt = B // bt

    const2 = lambda b, l: (0, 0)
    layer3 = lambda b, l: (l, 0, 0)

    in_specs = [
        pl.BlockSpec((bt, N, Kp), lambda b, l: (b, 0, 0)),        # patchified input (bf16)
        pl.BlockSpec((Kp, C), const2),                            # patch-embed weight
        pl.BlockSpec((N, C), const2),                             # abs PE (+ patch bias)
        pl.BlockSpec((bt, 1, 6, C), lambda b, l: (b, l, 0, 0)),   # per-layer adaLN chunks
        pl.BlockSpec((bt, 2, C), lambda b, l: (b, 0, 0)),         # final-layer adaLN chunks
        pl.BlockSpec((1, C, 3 * C), layer3),                      # fused qkv weight
        pl.BlockSpec((1, C, C), layer3),                          # attn out-proj weight
        pl.BlockSpec((1, C, Hm), layer3),                         # fc1 weight
        pl.BlockSpec((1, Hm, C), layer3),                         # fc2 weight
        pl.BlockSpec((1, 1, Wb), layer3),                         # packed per-layer biases
        pl.BlockSpec((C, doutp), const2),                         # final linear (lane-padded)
        pl.BlockSpec((1, doutp), const2),                         # final bias (lane-padded)
    ]

    # Size the scoped-VMEM request from actual block bytes (2-deep buffering of the
    # streamed per-layer weights) and cap well below v7x's 64 MiB physical VMEM.
    lay_bytes = 2 * ((C * 3 * C + C * C + C * Hm + Hm * C) * 2 + Wb * 4 + bt * 6 * C * 4)
    const_bytes = (bt * N * Kp * 2 + Kp * C * 2 + N * C * 4 + bt * 2 * C * 4
                   + C * doutp * 2 + doutp * 4)
    scratch_bytes = bt * N * C * 4
    out_bytes = 2 * bt * N * doutp * 4
    need = lay_bytes + const_bytes + scratch_bytes + out_bytes + (4 << 20)
    vmem_limit = int(min(max(need, 32 << 20), 48 << 20))

    kernel = functools.partial(_dit_fused_kernel, num_heads=num_heads,
                               bias_seg=prep["bias_seg"])
    return pl.pallas_call(
        kernel,
        out_shape=jax.ShapeDtypeStruct((B * N, doutp), jnp.float32),
        grid=(nbt, L),
        in_specs=in_specs,
        out_specs=pl.BlockSpec((bt * N, doutp), lambda b, l: (b, 0)),
        scratch_shapes=[pltpu.VMEM((bt, N, C), jnp.float32)],
        compiler_params=pltpu.CompilerParams(
            dimension_semantics=("parallel", "arbitrary"),
            vmem_limit_bytes=vmem_limit,
        ),
    )(xp, prep["w_patch"], pe_pb, mod_blk, mod_fin,
      prep["wqkv"], prep["wo"], prep["w1"], prep["w2"], prep["bias_pack"],
      prep["wf"], prep["bf"])


# ----------------------------- glue (plain JAX) ------------------------------

def make_pos_encoding(num_patches, d_model):
    i_seq = jnp.arange(num_patches, dtype=jnp.float32)[:, None]
    two_i = jnp.arange(0, d_model, 2, dtype=jnp.float32)[None, :]
    angle = i_seq / jnp.power(10000.0, two_i / d_model)
    pe = jnp.stack([jnp.sin(angle), jnp.cos(angle)], axis=2).reshape(num_patches, d_model)
    return pe


def timestep_frequency_embedding(t, dim=256, max_period=10000.0):
    half = dim // 2
    freqs = jnp.exp(-math.log(max_period) * jnp.arange(half, dtype=jnp.float32) / half)
    args = t[:, None].astype(jnp.float32) * freqs[None, :]
    return jnp.concatenate([jnp.cos(args), jnp.sin(args)], axis=-1)


def patchify(x, patch):
    # x: [B, Cin, H, W] (NCHW) -> [B, N, Cin*p*p] flattened in (c, kh, kw) order
    B, Cin, H, W = x.shape
    h, w = H // patch, W // patch
    xp = x.reshape(B, Cin, h, patch, w, patch)
    xp = xp.transpose(0, 2, 4, 1, 3, 5)              # [B, h, w, Cin, p, p]
    return xp.reshape(B, h * w, Cin * patch * patch)


def unpatchify(y, patch, out_ch):
    # y: [B, N, p*p*c] -> [B, c, H, W]
    B, N, _ = y.shape
    h = w = int(round(N ** 0.5))
    y = y.reshape(B, h, w, patch, patch, out_ch)
    y = y.transpose(0, 5, 1, 3, 2, 4)
    return y.reshape(B, out_ch, h * patch, w * patch)


def prepare_weights(params):
    """Stack per-block weights on a leading layer axis, pad patch-embed K and the
    final output dim to lane multiples, pack the tiny per-layer biases into one
    lane-dense array with 128-aligned segments, fuse all adaLN projections, and
    cast matmul operands to bf16 (biases / modulation stay f32)."""
    C = params["w_patch"].shape[1]
    blocks = params["blocks"]
    L = len(blocks)
    Hm = blocks[0]["w_fc1"].shape[1]
    bf16 = jnp.bfloat16

    def stack(key):
        return jnp.stack([b[key] for b in blocks], axis=0)

    # patch-embed weight, K lane-padded to a multiple of 128
    K = params["w_patch"].shape[0]
    Kp = _round_up(K, 128)
    w_patch = jnp.zeros((Kp, C), jnp.float32).at[:K].set(params["w_patch"])

    # final projection, output lane-padded to a multiple of 128 (lane-dense store)
    dout = params["f_lin_w"].shape[1]
    doutp = _round_up(dout, 128)
    wf = jnp.zeros((C, doutp), jnp.float32).at[:, :dout].set(params["f_lin_w"])
    bf_ = jnp.zeros((1, doutp), jnp.float32).at[:, :dout].set(params["f_lin_b"])

    # pack all tiny per-layer biases into ONE (L, 1, Wb) array, 128-aligned segments
    widths = [("b_qkv", 3 * C), ("b_out", C), ("b_fc1", Hm), ("b_fc2", C)]
    seg, off = {}, 0
    for name, w in widths:
        seg[name] = (off, w)
        off += _round_up(w, 128)
    Wb = off
    bias_pack = jnp.zeros((L, 1, Wb), jnp.float32)
    for name, w in widths:
        s, _ = seg[name]
        bias_pack = bias_pack.at[:, :, s:s + w].set(stack(name))

    return dict(
        n_layers=L, K=K, Kp=Kp, dout=dout, doutp=doutp, hidden=Hm,
        bias_seg=seg, bias_width=Wb,
        w_patch=w_patch.astype(bf16),
        wqkv=stack("w_qkv").astype(bf16),
        wo=stack("w_out").astype(bf16),
        w1=stack("w_fc1").astype(bf16),
        w2=stack("w_fc2").astype(bf16),
        bias_pack=bias_pack,
        wf=wf.astype(bf16), bf=bf_,
        w_ada_all=jnp.concatenate([b["w_ada"] for b in blocks] + [params["f_ada_w"]], axis=1),
        b_ada_all=jnp.concatenate([b["b_ada"] for b in blocks] + [params["f_ada_b"]], axis=1),
        t_w1=params["t_w1"], t_b1=params["t_b1"],
        t_w2=params["t_w2"], t_b2=params["t_b2"],
    )


def init_params(key, *, input_ch, n_ch, patch, n_blocks, out_ch, freq_dim=256, mlp_ratio=4):
    keys = iter(jax.random.split(key, 16 + 16 * n_blocks))

    def nrm(shape, std=0.02):
        return std * jax.random.normal(next(keys), shape, dtype=jnp.float32)

    K = input_ch * patch * patch
    params = {
        "w_patch": nrm((K, n_ch)), "b_patch": nrm((1, n_ch)),
        "t_w1": nrm((freq_dim, n_ch)), "t_b1": nrm((1, n_ch)),
        "t_w2": nrm((n_ch, n_ch)), "t_b2": nrm((1, n_ch)),
        "f_ada_w": nrm((n_ch, 2 * n_ch)), "f_ada_b": nrm((1, 2 * n_ch)),
        "f_lin_w": nrm((n_ch, patch * patch * out_ch)),
        "f_lin_b": nrm((1, patch * patch * out_ch)),
    }
    hidden = int(n_ch * mlp_ratio)
    blocks = []
    for _ in range(n_blocks):
        blocks.append(dict(
            w_ada=nrm((n_ch, 6 * n_ch)), b_ada=nrm((1, 6 * n_ch)),
            w_qkv=nrm((n_ch, 3 * n_ch)), b_qkv=nrm((1, 3 * n_ch)),
            w_out=nrm((n_ch, n_ch)), b_out=nrm((1, n_ch)),
            w_fc1=nrm((n_ch, hidden)), b_fc1=nrm((1, hidden)),
            w_fc2=nrm((hidden, n_ch)), b_fc2=nrm((1, n_ch)),
        ))
    params["blocks"] = blocks
    return params


def dit_forward_pallas(x, t, params, *, patch, num_heads, out_ch, batch_tile=None):
    C = params["w_patch"].shape[1]
    assert C % num_heads == 0
    prep = prepare_weights(params)
    L = prep["n_layers"]
    B = x.shape[0]
    bt = B if batch_tile is None else batch_tile

    xp = patchify(x, patch)                                   # (B, N, K)
    N, K = xp.shape[1], xp.shape[2]
    if prep["Kp"] != K:                                       # lane-pad K to 128
        xp = jnp.pad(xp, ((0, 0), (0, 0), (0, prep["Kp"] - K)))
    xp = xp.astype(jnp.bfloat16)

    pe_pb = make_pos_encoding(N, C) + params["b_patch"]       # fold patch bias into PE
    tf = timestep_frequency_embedding(t, 256)

    mod_all = cond_call(tf, prep["t_w1"], prep["t_b1"], prep["t_w2"], prep["t_b2"],
                        prep["w_ada_all"], prep["b_ada_all"])       # (B, 6*C*L + 2*C)
    mod_blk = mod_all[:, :6 * C * L].reshape(B, L, 6, C)            # (B, L, 6, C)
    mod_fin = mod_all[:, 6 * C * L:].reshape(B, 2, C)               # (B, 2, C)

    y = dit_fused_call(xp, pe_pb, mod_blk, mod_fin, prep,
                       num_heads=num_heads, batch_tile=bt)          # (B*N, doutp)
    y = y.reshape(B, N, prep["doutp"])[:, :, :prep["dout"]]
    return unpatchify(y, patch, out_ch)


# ----------------------------- pure-JAX reference (for checking) -------------

def dit_forward_ref(x, t, params, *, patch, num_heads, out_ch):
    hp = jax.lax.Precision.HIGHEST
    n_ch = params["w_patch"].shape[1]
    xp = patchify(x, patch)
    N = xp.shape[1]
    pe = make_pos_encoding(N, n_ch)

    xe = jnp.einsum("bnk,kd->bnd", xp, params["w_patch"], precision=hp) \
        + params["b_patch"] + pe

    tf = timestep_frequency_embedding(t, 256)
    h = _silu(jnp.dot(tf, params["t_w1"], precision=hp) + params["t_b1"])
    c = jnp.dot(h, params["t_w2"], precision=hp) + params["t_b2"]

    C = n_ch
    Dh = C // num_heads
    for blk in params["blocks"]:
        mod = jnp.dot(_silu(c), blk["w_ada"], precision=hp) + blk["b_ada"]
        sh_msa, sc_msa, g_msa, sh_mlp, sc_mlp, g_mlp = jnp.split(mod, 6, axis=-1)

        x1 = _layernorm(xe) * (1.0 + sc_msa[:, None, :]) + sh_msa[:, None, :]
        qkv = jnp.einsum("bnc,cd->bnd", x1, blk["w_qkv"], precision=hp) + blk["b_qkv"]
        q, k, v = jnp.split(qkv, 3, axis=-1)
        B_, N_, _ = q.shape
        q = q.reshape(B_, N_, num_heads, Dh).transpose(0, 2, 1, 3)
        k = k.reshape(B_, N_, num_heads, Dh).transpose(0, 2, 1, 3)
        v = v.reshape(B_, N_, num_heads, Dh).transpose(0, 2, 1, 3)
        s = jnp.einsum("bhnd,bhmd->bhnm", q, k, precision=hp) / math.sqrt(Dh)
        p = jax.nn.softmax(s, axis=-1)
        o = jnp.einsum("bhnm,bhmd->bhnd", p, v, precision=hp)
        o = o.transpose(0, 2, 1, 3).reshape(B_, N_, C)
        att = jnp.einsum("bnc,cd->bnd", o, blk["w_out"], precision=hp) + blk["b_out"]
        xe = xe + g_msa[:, None, :] * att

        x2 = _layernorm(xe) * (1.0 + sc_mlp[:, None, :]) + sh_mlp[:, None, :]
        hmid = _gelu_tanh(jnp.einsum("bnc,ch->bnh", x2, blk["w_fc1"], precision=hp) + blk["b_fc1"])
        mlp = jnp.einsum("bnh,hc->bnc", hmid, blk["w_fc2"], precision=hp) + blk["b_fc2"]
        xe = xe + g_mlp[:, None, :] * mlp

    mod = jnp.dot(_silu(c), params["f_ada_w"], precision=hp) + params["f_ada_b"]
    chunk0, chunk1 = jnp.split(mod, 2, axis=-1)
    xm = _layernorm(xe) * (1.0 + chunk0[:, None, :]) + chunk1[:, None, :]
    y = jnp.einsum("bnc,cd->bnd", xm, params["f_lin_w"], precision=hp) + params["f_lin_b"]
    return unpatchify(y, patch, out_ch)


# ----------------------------- main -------------------------------------------

if __name__ == "__main__":
    # Small DiT: input_size=16, patch_size=4, input_ch=4, n_ch=64, n_blocks=2,
    # num_heads=4, mlp_ratio=4, learn_sigma=False, pe='abs'.
    B, Cin, HW, P = 2, 4, 16, 4
    N_CH, N_BLOCKS, HEADS = 64, 2, 4
    OUT_CH = Cin  # learn_sigma=False

    key = jax.random.PRNGKey(0)
    kx, kt, kp = jax.random.split(key, 3)
    x = jax.random.normal(kx, (B, Cin, HW, HW), dtype=jnp.float32)
    t = jax.random.uniform(kt, (B,), dtype=jnp.float32) * 1000.0
    params = init_params(kp, input_ch=Cin, n_ch=N_CH, patch=P,
                         n_blocks=N_BLOCKS, out_ch=OUT_CH)

    # batch_tile=1 exercises the leading "parallel" batch-tile grid axis
    # (megacore sharding on v7x); on single-TC parts the tiles run sequentially.
    fwd = jax.jit(functools.partial(dit_forward_pallas, patch=P, num_heads=HEADS,
                                    out_ch=OUT_CH, batch_tile=1))
    out = jax.block_until_ready(fwd(x, t, params))
    assert out.shape == (B, OUT_CH, HW, HW), out.shape

    ref = dit_forward_ref(x, t, params, patch=P, num_heads=HEADS, out_ch=OUT_CH)
    max_diff = float(jnp.max(jnp.abs(out - ref)))
    # Kernel path uses bf16 matmul operands (f32 accumulation) + approx reciprocal
    # in the softmax; reference is f32 HIGHEST, so allow a loose absolute tolerance.
    assert max_diff < 2e-2, f"mismatch vs reference: max|diff|={max_diff}"

    # TODO(synk): DropPath / attention dropout are identity at rate 0.0 and are not
    # implemented as stochastic ops; learn_sigma / 'rope' PE paths not exercised.
    print("KERNEL_OK")
</pallas_src>

<mosaic_0001>
module attributes {stable_mosaic.version = 11 : i64} {
  func.func @_cond_kernel(%arg0: memref<2x256xf32, #tpu.memory_space<vmem>>, %arg1: memref<256x64xf32, #tpu.memory_space<vmem>>, %arg2: memref<1x64xf32, #tpu.memory_space<vmem>>, %arg3: memref<64x64xf32, #tpu.memory_space<vmem>>, %arg4: memref<1x64xf32, #tpu.memory_space<vmem>>, %arg5: memref<64x896xf32, #tpu.memory_space<vmem>>, %arg6: memref<1x896xf32, #tpu.memory_space<vmem>>, %arg7: memref<2x896xf32, #tpu.memory_space<vmem>>) attributes {dimension_semantics = [], scalar_prefetch = 0 : i64, scratch_operands = 0 : i64, tpu.core_type = #tpu.core_type<tc>} {
    %c0 = arith.constant 0 : index
    %c0_0 = arith.constant 0 : index
    %0 = vector.load %arg0[%c0, %c0_0] : memref<2x256xf32, #tpu.memory_space<vmem>>, vector<2x256xf32>
    %c0_1 = arith.constant 0 : index
    %c0_2 = arith.constant 0 : index
    %1 = vector.load %arg1[%c0_1, %c0_2] : memref<256x64xf32, #tpu.memory_space<vmem>>, vector<256x64xf32>
    %cst = arith.constant dense<0.000000e+00> : vector<2x64xf32>
    %2 = tpu.matmul %0, %1, %cst {dimension_numbers = #tpu.dot_dimension_numbers<[1], [0], [0], [1], [0, 0, 1, 1], [], []>} : vector<2x256xf32>, vector<256x64xf32>, vector<2x64xf32> -> vector<2x64xf32>
    %c0_3 = arith.constant 0 : index
    %c0_4 = arith.constant 0 : index
    %3 = vector.load %arg2[%c0_3, %c0_4] : memref<1x64xf32, #tpu.memory_space<vmem>>, vector<1x64xf32>
    %4 = vector.broadcast %3 : vector<1x64xf32> to vector<2x64xf32>
    %5 = arith.addf %2, %4 : vector<2x64xf32>
    %6 = arith.negf %5 : vector<2x64xf32>
    %7 = math.exp %6 : vector<2x64xf32>
    %cst_5 = arith.constant 1.000000e+00 : f32
    %8 = vector.broadcast %cst_5 : f32 to vector<2x64xf32>
    %9 = arith.addf %8, %7 : vector<2x64xf32>
    %10 = arith.divf %8, %9 : vector<2x64xf32>
    %11 = arith.mulf %5, %10 : vector<2x64xf32>
    %c0_6 = arith.constant 0 : index
    %c0_7 = arith.constant 0 : index
    %12 = vector.load %arg3[%c0_6, %c0_7] : memref<64x64xf32, #tpu.memory_space<vmem>>, vector<64x64xf32>
    %cst_8 = arith.constant dense<0.000000e+00> : vector<2x64xf32>
    %13 = tpu.matmul %11, %12, %cst_8 {dimension_numbers = #tpu.dot_dimension_numbers<[1], [0], [0], [1], [0, 0, 1, 1], [], []>} : vector<2x64xf32>, vector<64x64xf32>, vector<2x64xf32> -> vector<2x64xf32>
    %c0_9 = arith.constant 0 : index
    %c0_10 = arith.constant 0 : index
    %14 = vector.load %arg4[%c0_9, %c0_10] : memref<1x64xf32, #tpu.memory_space<vmem>>, vector<1x64xf32>
    %15 = vector.broadcast %14 : vector<1x64xf32> to vector<2x64xf32>
    %16 = arith.addf %13, %15 : vector<2x64xf32>
    %17 = arith.negf %16 : vector<2x64xf32>
    %18 = math.exp %17 : vector<2x64xf32>
    %cst_11 = arith.constant 1.000000e+00 : f32
    %19 = vector.broadcast %cst_11 : f32 to vector<2x64xf32>
    %20 = arith.addf %19, %18 : vector<2x64xf32>
    %21 = arith.divf %19, %20 : vector<2x64xf32>
    %22 = arith.mulf %16, %21 : vector<2x64xf32>
    %c0_12 = arith.constant 0 : index
    %c0_13 = arith.constant 0 : index
    %23 = vector.load %arg5[%c0_12, %c0_13] : memref<64x896xf32, #tpu.memory_space<vmem>>, vector<64x896xf32>
    %cst_14 = arith.constant dense<0.000000e+00> : vector<2x896xf32>
    %24 = tpu.matmul %22, %23, %cst_14 {dimension_numbers = #tpu.dot_dimension_numbers<[1], [0], [0], [1], [0, 0, 1, 1], [], []>} : vector<2x64xf32>, vector<64x896xf32>, vector<2x896xf32> -> vector<2x896xf32>
    %c0_15 = arith.constant 0 : index
    %c0_16 = arith.constant 0 : index
    %25 = vector.load %arg6[%c0_15, %c0_16] : memref<1x896xf32, #tpu.memory_space<vmem>>, vector<1x896xf32>
    %26 = vector.broadcast %25 : vector<1x896xf32> to vector<2x896xf32>
    %27 = arith.addf %24, %26 : vector<2x896xf32>
    %c0_17 = arith.constant 0 : index
    %c0_18 = arith.constant 0 : index
    %28 = vector.load %arg7[%c0_17, %c0_18] : memref<2x896xf32, #tpu.memory_space<vmem>>, vector<2x896xf32>
    tpu.vector_store %arg7[%c0_17, %c0_18], %27 {strides = array<i32>} : memref<2x896xf32, #tpu.memory_space<vmem>>, vector<2x896xf32>,
    return
  }
}

module attributes {stable_mosaic.version = 11 : i64} {
  func.func @_dit_fused_kernel(%arg0: i32, %arg1: i32, %arg2: memref<1x16x128xbf16, #tpu.memory_space<vmem>>, %arg3: memref<128x64xbf16, #tpu.memory_space<vmem>>, %arg4: memref<16x64xf32, #tpu.memory_space<vmem>>, %arg5: memref<1x1x6x64xf32, #tpu.memory_space<vmem>>, %arg6: memref<1x2x64xf32, #tpu.memory_space<vmem>>, %arg7: memref<1x64x192xbf16, #tpu.memory_space<vmem>>, %arg8: memref<1x64x64xbf16, #tpu.memory_space<vmem>>, %arg9: memref<1x64x256xbf16, #tpu.memory_space<vmem>>, %arg10: memref<1x256x64xbf16, #tpu.memory_space<vmem>>, %arg11: memref<1x1x768xf32, #tpu.memory_space<vmem>>, %arg12: memref<64x128xbf16, #tpu.memory_space<vmem>>, %arg13: memref<1x128xf32, #tpu.memory_space<vmem>>, %arg14: memref<16x128xf32, #tpu.memory_space<vmem>>, %arg15: memref<1x16x64xf32, #tpu.memory_space<vmem>>) attributes {dimension_semantics = [#tpu.dimension_semantics<parallel>, #tpu.dimension_semantics<arbitrary>], iteration_bounds = array<i64: 2, 2>, scalar_prefetch = 0 : i64, scratch_operands = 1 : i64, tpu.core_type = #tpu.core_type<tc>, window_params = [{transform_indices = @transform_0, window_bounds = array<i64: 1, 16, 128>}, {pipeline_mode = #tpu.pipeline_mode<synchronous>, transform_indices = @transform_1, window_bounds = array<i64: 128, 64>}, {pipeline_mode = #tpu.pipeline_mode<synchronous>, transform_indices = @transform_2, window_bounds = array<i64: 16, 64>}, {transform_indices = @transform_3, window_bounds = array<i64: 1, 1, 6, 64>}, {transform_indices = @transform_4, window_bounds = array<i64: 1, 2, 64>}, {transform_indices = @transform_5, window_bounds = array<i64: 1, 64, 192>}, {transform_indices = @transform_6, window_bounds = array<i64: 1, 64, 64>}, {transform_indices = @transform_7, window_bounds = array<i64: 1, 64, 256>}, {transform_indices = @transform_8, window_bounds = array<i64: 1, 256, 64>}, {transform_indices = @transform_9, window_bounds = array<i64: 1, 1, 768>}, {pipeline_mode = #tpu.pipeline_mode<synchronous>, transform_indices = @transform_10, window_bounds = array<i64: 64, 128>}, {pipeline_mode = #tpu.pipeline_mode<synchronous>, transform_indices = @transform_11, window_bounds = array<i64: 1, 128>}, {transform_indices = @transform_12, window_bounds = array<i64: 16, 128>}]} {
    %c0_i32 = arith.constant 0 : i32
    %0 = arith.cmpi eq, %arg1, %c0_i32 : i32
    %1 = arith.extui %0 : i1 to i32
    %c0_i32_0 = arith.constant 0 : i32
    %2 = arith.cmpi ne, %1, %c0_i32_0 : i32
    scf.if %2 {
      %c0_71 = arith.constant 0 : index
      %c0_72 = arith.constant 0 : index
      %c0_73 = arith.constant 0 : index
      %219 = vector.load %arg2[%c0_71, %c0_72, %c0_73] : memref<1x16x128xbf16, #tpu.memory_space<vmem>>, vector<1x16x128xbf16>
      %220 = vector.shape_cast %219 : vector<1x16x128xbf16> to vector<16x128xbf16>
      %c0_74 = arith.constant 0 : index
      %c0_75 = arith.constant 0 : index
      %221 = vector.load %arg3[%c0_74, %c0_75] : memref<128x64xbf16, #tpu.memory_space<vmem>>, vector<128x64xbf16>
      %cst_76 = arith.constant dense<0.000000e+00> : vector<16x64xf32>
      %222 = tpu.matmul %220, %221, %cst_76 {dimension_numbers = #tpu.dot_dimension_numbers<[1], [0], [0], [1], [0, 0, 1, 1], [], []>} : vector<16x128xbf16>, vector<128x64xbf16>, vector<16x64xf32> -> vector<16x64xf32>
      %223 = vector.shape_cast %222 : vector<16x64xf32> to vector<1x16x64xf32>
      %c0_77 = arith.constant 0 : index
      %c0_78 = arith.constant 0 : index
      %224 = vector.load %arg4[%c0_77, %c0_78] : memref<16x64xf32, #tpu.memory_space<vmem>>, vector<16x64xf32>
      %225 = vector.shape_cast %224 : vector<16x64xf32> to vector<1x16x64xf32>
      %226 = arith.addf %223, %225 : vector<1x16x64xf32>
      %c0_79 = arith.constant 0 : index
      %c0_80 = arith.constant 0 : index
      %c0_81 = arith.constant 0 : index
      %227 = vector.load %arg15[%c0_79, %c0_80, %c0_81] : memref<1x16x64xf32, #tpu.memory_space<vmem>>, vector<1x16x64xf32>
      tpu.vector_store %arg15[%c0_79, %c0_80, %c0_81], %226 {strides = array<i32>} : memref<1x16x64xf32, #tpu.memory_space<vmem>>, vector<1x16x64xf32>,
    } else {
    }
    %c0 = arith.constant 0 : index
    %c0_1 = arith.constant 0 : index
    %c0_2 = arith.constant 0 : index
    %3 = vector.load %arg15[%c0, %c0_1, %c0_2] : memref<1x16x64xf32, #tpu.memory_space<vmem>>, vector<1x16x64xf32>
    %c0_3 = arith.constant 0 : index
    %c0_4 = arith.constant 0 : index
    %c0_5 = arith.constant 0 : index
    %c0_6 = arith.constant 0 : index
    %4 = vector.load %arg5[%c0_3, %c0_4, %c0_5, %c0_6] : memref<1x1x6x64xf32, #tpu.memory_space<vmem>>, vector<1x1x6x64xf32>
    %5 = vector.shape_cast %4 : vector<1x1x6x64xf32> to vector<1x6x64xf32>
    %6 = vector.extract_strided_slice %5 {offsets = [0, 0, 0], sizes = [1, 1, 64], strides = [1, 1, 1]} : vector<1x6x64xf32> to vector<1x1x64xf32>
    %7 = vector.shape_cast %6 : vector<1x1x64xf32> to vector<1x64xf32>
    %8 = vector.shape_cast %7 : vector<1x64xf32> to vector<1x1x64xf32>
    %9 = vector.extract_strided_slice %5 {offsets = [0, 1, 0], sizes = [1, 1, 64], strides = [1, 1, 1]} : vector<1x6x64xf32> to vector<1x1x64xf32>
    %10 = vector.shape_cast %9 : vector<1x1x64xf32> to vector<1x64xf32>
    %11 = vector.shape_cast %10 : vector<1x64xf32> to vector<1x1x64xf32>
    %12 = vector.extract_strided_slice %5 {offsets = [0, 2, 0], sizes = [1, 1, 64], strides = [1, 1, 1]} : vector<1x6x64xf32> to vector<1x1x64xf32>
    %13 = vector.shape_cast %12 : vector<1x1x64xf32> to vector<1x64xf32>
    %14 = vector.shape_cast %13 : vector<1x64xf32> to vector<1x1x64xf32>
    %15 = vector.extract_strided_slice %5 {offsets = [0, 3, 0], sizes = [1, 1, 64], strides = [1, 1, 1]} : vector<1x6x64xf32> to vector<1x1x64xf32>
    %16 = vector.shape_cast %15 : vector<1x1x64xf32> to vector<1x64xf32>
    %17 = vector.shape_cast %16 : vector<1x64xf32> to vector<1x1x64xf32>
    %18 = vector.extract_strided_slice %5 {offsets = [0, 4, 0], sizes = [1, 1, 64], strides = [1, 1, 1]} : vector<1x6x64xf32> to vector<1x1x64xf32>
    %19 = vector.shape_cast %18 : vector<1x1x64xf32> to vector<1x64xf32>
    %20 = vector.shape_cast %19 : vector<1x64xf32> to vector<1x1x64xf32>
    %21 = vector.extract_strided_slice %5 {offsets = [0, 5, 0], sizes = [1, 1, 64], strides = [1, 1, 1]} : vector<1x6x64xf32> to vector<1x1x64xf32>
    %22 = vector.shape_cast %21 : vector<1x1x64xf32> to vector<1x64xf32>
    %23 = vector.shape_cast %22 : vector<1x64xf32> to vector<1x1x64xf32>
    %cst = arith.constant dense<0.000000e+00> : vector<1x16xf32>
    %24 = vector.multi_reduction <add>, %3, %cst [2] : vector<1x16x64xf32> to vector<1x16xf32>
    %25 = vector.shape_cast %24 : vector<1x16xf32> to vector<1x16x1xf32>
    %cst_7 = arith.constant 6.400000e+01 : f32
    %26 = vector.broadcast %cst_7 : f32 to vector<1x16x1xf32>
    %27 = arith.divf %25, %26 : vector<1x16x1xf32>
    %28 = vector.broadcast %27 : vector<1x16x1xf32> to vector<1x16x64xf32>
    %29 = arith.subf %3, %28 : vector<1x16x64xf32>
    %30 = arith.mulf %29, %29 : vector<1x16x64xf32>
    %cst_8 = arith.constant dense<0.000000e+00> : vector<1x16xf32>
    %31 = vector.multi_reduction <add>, %30, %cst_8 [2] : vector<1x16x64xf32> to vector<1x16xf32>
    %32 = vector.shape_cast %31 : vector<1x16xf32> to vector<1x16x1xf32>
    %cst_9 = arith.constant 6.400000e+01 : f32
    %33 = vector.broadcast %cst_9 : f32 to vector<1x16x1xf32>
    %34 = arith.divf %32, %33 : vector<1x16x1xf32>
    %35 = vector.broadcast %27 : vector<1x16x1xf32> to vector<1x16x64xf32>
    %36 = arith.subf %3, %35 : vector<1x16x64xf32>
    %cst_10 = arith.constant 9.99999997E-7 : f32
    %37 = vector.broadcast %cst_10 : f32 to vector<1x16x1xf32>
    %38 = arith.addf %34, %37 : vector<1x16x1xf32>
    %39 = math.rsqrt %38 : vector<1x16x1xf32>
    %40 = vector.broadcast %39 : vector<1x16x1xf32> to vector<1x16x64xf32>
    %41 = arith.mulf %36, %40 : vector<1x16x64xf32>
    %cst_11 = arith.constant 1.000000e+00 : f32
    %42 = vector.broadcast %cst_11 : f32 to vector<1x1x64xf32>
    %43 = arith.addf %42, %11 : vector<1x1x64xf32>
    %44 = vector.broadcast %43 : vector<1x1x64xf32> to vector<1x16x64xf32>
    %45 = arith.mulf %41, %44 : vector<1x16x64xf32>
    %46 = vector.broadcast %8 : vector<1x1x64xf32> to vector<1x16x64xf32>
    %47 = arith.addf %45, %46 : vector<1x16x64xf32>
    %48 = vector.shape_cast %47 : vector<1x16x64xf32> to vector<16x64xf32>
    %49 = arith.truncf %48 : vector<16x64xf32> to vector<16x64xbf16>
    %c0_12 = arith.constant 0 : index
    %c0_13 = arith.constant 0 : index
    %c0_14 = arith.constant 0 : index
    %50 = vector.load %arg7[%c0_12, %c0_13, %c0_14] : memref<1x64x192xbf16, #tpu.memory_space<vmem>>, vector<1x64x192xbf16>
    %51 = vector.shape_cast %50 : vector<1x64x192xbf16> to vector<64x192xbf16>
    %cst_15 = arith.constant dense<0.000000e+00> : vector<16x192xf32>
    %52 = tpu.matmul %49, %51, %cst_15 {dimension_numbers = #tpu.dot_dimension_numbers<[1], [0], [0], [1], [0, 0, 1, 1], [], []>} : vector<16x64xbf16>, vector<64x192xbf16>, vector<16x192xf32> -> vector<16x192xf32>
    %c0_16 = arith.constant 0 : index
    %c0_17 = arith.constant 0 : index
    %c0_18 = arith.constant 0 : index
    %53 = vector.load %arg11[%c0_16, %c0_17, %c0_18] : memref<1x1x768xf32, #tpu.memory_space<vmem>>, vector<1x1x192xf32>
    %54 = vector.shape_cast %53 : vector<1x1x192xf32> to vector<1x192xf32>
    %55 = vector.broadcast %54 : vector<1x192xf32> to vector<16x192xf32>
    %56 = arith.addf %52, %55 : vector<16x192xf32>
    %57 = vector.shape_cast %56 : vector<16x192xf32> to vector<1x16x192xf32>
    %58 = vector.extract_strided_slice %57 {offsets = [0, 0, 0], sizes = [1, 16, 16], strides = [1, 1, 1]} : vector<1x16x192xf32> to vector<1x16x16xf32>
    %cst_19 = arith.constant 2.500000e-01 : f32
    %59 = vector.broadcast %cst_19 : f32 to vector<1x16x16xf32>
    %60 = arith.mulf %58, %59 : vector<1x16x16xf32>
    %61 = arith.truncf %60 : vector<1x16x16xf32> to vector<1x16x16xbf16>
    %62 = vector.extract_strided_slice %57 {offsets = [0, 0, 64], sizes = [1, 16, 16], strides = [1, 1, 1]} : vector<1x16x192xf32> to vector<1x16x16xf32>
    %63 = arith.truncf %62 : vector<1x16x16xf32> to vector<1x16x16xbf16>
    %64 = vector.extract_strided_slice %57 {offsets = [0, 0, 128], sizes = [1, 16, 16], strides = [1, 1, 1]} : vector<1x16x192xf32> to vector<1x16x16xf32>
    %65 = arith.truncf %64 : vector<1x16x16xf32> to vector<1x16x16xbf16>
    "tpu.trace_start"() <{level = 10 : i32, message = "bnd,bmd->bnm"}> : () -> ()
    %cst_20 = arith.constant dense<0.000000e+00> : vector<1x16x16xf32>
    %66 = tpu.matmul %61, %63, %cst_20 {dimension_numbers = #tpu.dot_dimension_numbers<[2], [2], [1], [1], [0, 0, 0, 1, 1, 1], [0], [0]>} : vector<1x16x16xbf16>, vector<1x16x16xbf16>, vector<1x16x16xf32> -> vector<1x16x16xf32>
    "tpu.trace_stop"() : () -> ()
    %cst_21 = arith.constant dense<0xFF800000> : vector<1x16xf32>
    %67 = vector.multi_reduction <maximumf>, %66, %cst_21 [2] : vector<1x16x16xf32> to vector<1x16xf32>
    %68 = vector.shape_cast %67 : vector<1x16xf32> to vector<1x16x1xf32>
    %69 = vector.broadcast %68 : vector<1x16x1xf32> to vector<1x16x16xf32>
    %70 = arith.subf %66, %69 : vector<1x16x16xf32>
    %71 = math.exp %70 : vector<1x16x16xf32>
    %cst_22 = arith.constant dense<0.000000e+00> : vector<1x16xf32>
    %72 = vector.multi_reduction <add>, %71, %cst_22 [2] : vector<1x16x16xf32> to vector<1x16xf32>
    %73 = vector.shape_cast %72 : vector<1x16xf32> to vector<1x16x1xf32>
    %74 = tpu.reciprocal %73 {approx = true} : vector<1x16x1xf32> -> vector<1x16x1xf32>
    %75 = vector.broadcast %74 : vector<1x16x1xf32> to vector<1x16x16xf32>
    %76 = arith.mulf %71, %75 : vector<1x16x16xf32>
    %77 = arith.truncf %76 : vector<1x16x16xf32> to vector<1x16x16xbf16>
    "tpu.trace_start"() <{level = 10 : i32, message = "bnm,bmd->bnd"}> : () -> ()
    %cst_23 = arith.constant dense<0.000000e+00> : vector<1x16x16xf32>
    %78 = tpu.matmul %77, %65, %cst_23 {dimension_numbers = #tpu.dot_dimension_numbers<[2], [1], [1], [2], [0, 0, 0, 1, 1, 2], [0], [0]>} : vector<1x16x16xbf16>, vector<1x16x16xbf16>, vector<1x16x16xf32> -> vector<1x16x16xf32>
    "tpu.trace_stop"() : () -> ()
    %79 = vector.extract_strided_slice %57 {offsets = [0, 0, 16], sizes = [1, 16, 16], strides = [1, 1, 1]} : vector<1x16x192xf32> to vector<1x16x16xf32>
    %cst_24 = arith.constant 2.500000e-01 : f32
    %80 = vector.broadcast %cst_24 : f32 to vector<1x16x16xf32>
    %81 = arith.mulf %79, %80 : vector<1x16x16xf32>
    %82 = arith.truncf %81 : vector<1x16x16xf32> to vector<1x16x16xbf16>
    %83 = vector.extract_strided_slice %57 {offsets = [0, 0, 80], sizes = [1, 16, 16], strides = [1, 1, 1]} : vector<1x16x192xf32> to vector<1x16x16xf32>
    %84 = arith.truncf %83 : vector<1x16x16xf32> to vector<1x16x16xbf16>
    %85 = vector.extract_strided_slice %57 {offsets = [0, 0, 144], sizes = [1, 16, 16], strides = [1, 1, 1]} : vector<1x16x192xf32> to vector<1x16x16xf32>
    %86 = arith.truncf %85 : vector<1x16x16xf32> to vector<1x16x16xbf16>
    "tpu.trace_start"() <{level = 10 : i32, message = "bnd,bmd->bnm"}> : () -> ()
    %cst_25 = arith.constant dense<0.000000e+00> : vector<1x16x16xf32>
    %87 = tpu.matmul %82, %84, %cst_25 {dimension_numbers = #tpu.dot_dimension_numbers<[2], [2], [1], [1], [0, 0, 0, 1, 1, 1], [0], [0]>} : vector<1x16x16xbf16>, vector<1x16x16xbf16>, vector<1x16x16xf32> -> vector<1x16x16xf32>
    "tpu.trace_stop"() : () -> ()
    %cst_26 = arith.constant dense<0xFF800000> : vector<1x16xf32>
    %88 = vector.multi_reduction <maximumf>, %87, %cst_26 [2] : vector<1x16x16xf32> to vector<1x16xf32>
    %89 = vector.shape_cast %88 : vector<1x16xf32> to vector<1x16x1xf32>
    %90 = vector.broadcast %89 : vector<1x16x1xf32> to vector<1x16x16xf32>
    %91 = arith.subf %87, %90 : vector<1x16x16xf32>
    %92 = math.exp %91 : vector<1x16x16xf32>
    %cst_27 = arith.constant dense<0.000000e+00> : vector<1x16xf32>
    %93 = vector.multi_reduction <add>, %92, %cst_27 [2] : vector<1x16x16xf32> to vector<1x16xf32>
    %94 = vector.shape_cast %93 : vector<1x16xf32> to vector<1x16x1xf32>
    %95 = tpu.reciprocal %94 {approx = true} : vector<1x16x1xf32> -> vector<1x16x1xf32>
    %96 = vector.broadcast %95 : vector<1x16x1xf32> to vector<1x16x16xf32>
    %97 = arith.mulf %92, %96 : vector<1x16x16xf32>
    %98 = arith.truncf %97 : vector<1x16x16xf32> to vector<1x16x16xbf16>
    "tpu.trace_start"() <{level = 10 : i32, message = "bnm,bmd->bnd"}> : () -> ()
    %cst_28 = arith.constant dense<0.000000e+00> : vector<1x16x16xf32>
    %99 = tpu.matmul %98, %86, %cst_28 {dimension_numbers = #tpu.dot_dimension_numbers<[2], [1], [1], [2], [0, 0, 0, 1, 1, 2], [0], [0]>} : vector<1x16x16xbf16>, vector<1x16x16xbf16>, vector<1x16x16xf32> -> vector<1x16x16xf32>
    "tpu.trace_stop"() : () -> ()
    %100 = vector.extract_strided_slice %57 {offsets = [0, 0, 32], sizes = [1, 16, 16], strides = [1, 1, 1]} : vector<1x16x192xf32> to vector<1x16x16xf32>
    %cst_29 = arith.constant 2.500000e-01 : f32
    %101 = vector.broadcast %cst_29 : f32 to vector<1x16x16xf32>
    %102 = arith.mulf %100, %101 : vector<1x16x16xf32>
    %103 = arith.truncf %102 : vector<1x16x16xf32> to vector<1x16x16xbf16>
    %104 = vector.extract_strided_slice %57 {offsets = [0, 0, 96], sizes = [1, 16, 16], strides = [1, 1, 1]} : vector<1x16x192xf32> to vector<1x16x16xf32>
    %105 = arith.truncf %104 : vector<1x16x16xf32> to vector<1x16x16xbf16>
    %106 = vector.extract_strided_slice %57 {offsets = [0, 0, 160], sizes = [1, 16, 16], strides = [1, 1, 1]} : vector<1x16x192xf32> to vector<1x16x16xf32>
    %107 = arith.truncf %106 : vector<1x16x16xf32> to vector<1x16x16xbf16>
    "tpu.trace_start"() <{level = 10 : i32, message = "bnd,bmd->bnm"}> : () -> ()
    %cst_30 = arith.constant dense<0.000000e+00> : vector<1x16x16xf32>
    %108 = tpu.matmul %103, %105, %cst_30 {dimension_numbers = #tpu.dot_dimension_numbers<[2], [2], [1], [1], [0, 0, 0, 1, 1, 1], [0], [0]>} : vector<1x16x16xbf16>, vector<1x16x16xbf16>, vector<1x16x16xf32> -> vector<1x16x16xf32>
    "tpu.trace_stop"() : () -> ()
    %cst_31 = arith.constant dense<0xFF800000> : vector<1x16xf32>
    %109 = vector.multi_reduction <maximumf>, %108, %cst_31 [2] : vector<1x16x16xf32> to vector<1x16xf32>
    %110 = vector.shape_cast %109 : vector<1x16xf32> to vector<1x16x1xf32>
    %111 = vector.broadcast %110 : vector<1x16x1xf32> to vector<1x16x16xf32>
    %112 = arith.subf %108, %111 : vector<1x16x16xf32>
    %113 = math.exp %112 : vector<1x16x16xf32>
    %cst_32 = arith.constant dense<0.000000e+00> : vector<1x16xf32>
    %114 = vector.multi_reduction <add>, %113, %cst_32 [2] : vector<1x16x16xf32> to vector<1x16xf32>
    %115 = vector.shape_cast %114 : vector<1x16xf32> to vector<1x16x1xf32>
    %116 = tpu.reciprocal %115 {approx = true} : vector<1x16x1xf32> -> vector<1x16x1xf32>
    %117 = vector.broadcast %116 : vector<1x16x1xf32> to vector<1x16x16xf32>
    %118 = arith.mulf %113, %117 : vector<1x16x16xf32>
    %119 = arith.truncf %118 : vector<1x16x16xf32> to vector<1x16x16xbf16>
    "tpu.trace_start"() <{level = 10 : i32, message = "bnm,bmd->bnd"}> : () -> ()
    %cst_33 = arith.constant dense<0.000000e+00> : vector<1x16x16xf32>
    %120 = tpu.matmul %119, %107, %cst_33 {dimension_numbers = #tpu.dot_dimension_numbers<[2], [1], [1], [2], [0, 0, 0, 1, 1, 2], [0], [0]>} : vector<1x16x16xbf16>, vector<1x16x16xbf16>, vector<1x16x16xf32> -> vector<1x16x16xf32>
    "tpu.trace_stop"() : () -> ()
    %121 = vector.extract_strided_slice %57 {offsets = [0, 0, 48], sizes = [1, 16, 16], strides = [1, 1, 1]} : vector<1x16x192xf32> to vector<1x16x16xf32>
    %cst_34 = arith.constant 2.500000e-01 : f32
    %122 = vector.broadcast %cst_34 : f32 to vector<1x16x16xf32>
    %123 = arith.mulf %121, %122 : vector<1x16x16xf32>
    %124 = arith.truncf %123 : vector<1x16x16xf32> to vector<1x16x16xbf16>
    %125 = vector.extract_strided_slice %57 {offsets = [0, 0, 112], sizes = [1, 16, 16], strides = [1, 1, 1]} : vector<1x16x192xf32> to vector<1x16x16xf32>
    %126 = arith.truncf %125 : vector<1x16x16xf32> to vector<1x16x16xbf16>
    %127 = vector.extract_strided_slice %57 {offsets = [0, 0, 176], sizes = [1, 16, 16], strides = [1, 1, 1]} : vector<1x16x192xf32> to vector<1x16x16xf32>
    %128 = arith.truncf %127 : vector<1x16x16xf32> to vector<1x16x16xbf16>
    "tpu.trace_start"() <{level = 10 : i32, message = "bnd,bmd->bnm"}> : () -> ()
    %cst_35 = arith.constant dense<0.000000e+00> : vector<1x16x16xf32>
    %129 = tpu.matmul %124, %126, %cst_35 {dimension_numbers = #tpu.dot_dimension_numbers<[2], [2], [1], [1], [0, 0, 0, 1, 1, 1], [0], [0]>} : vector<1x16x16xbf16>, vector<1x16x16xbf16>, vector<1x16x16xf32> -> vector<1x16x16xf32>
    "tpu.trace_stop"() : () -> ()
    %cst_36 = arith.constant dense<0xFF800000> : vector<1x16xf32>
    %130 = vector.multi_reduction <maximumf>, %129, %cst_36 [2] : vector<1x16x16xf32> to vector<1x16xf32>
    %131 = vector.shape_cast %130 : vector<1x16xf32> to vector<1x16x1xf32>
    %132 = vector.broadcast %131 : vector<1x16x1xf32> to vector<1x16x16xf32>
    %133 = arith.subf %129, %132 : vector<1x16x16xf32>
    %134 = math.exp %133 : vector<1x16x16xf32>
    %cst_37 = arith.constant dense<0.000000e+00> : vector<1x16xf32>
    %135 = vector.multi_reduction <add>, %134, %cst_37 [2] : vector<1x16x16xf32> to vector<1x16xf32>
    %136 = vector.shape_cast %135 : vector<1x16xf32> to vector<1x16x1xf32>
    %137 = tpu.reciprocal %136 {approx = true} : vector<1x16x1xf32> -> vector<1x16x1xf32>
    %138 = vector.broadcast %137 : vector<1x16x1xf32> to vector<1x16x16xf32>
    %139 = arith.mulf %134, %138 : vector<1x16x16xf32>
    %140 = arith.truncf %139 : vector<1x16x16xf32> to vector<1x16x16xbf16>
    "tpu.trace_start"() <{level = 10 : i32, message = "bnm,bmd->bnd"}> : () -> ()
    %cst_38 = arith.constant dense<0.000000e+00> : vector<1x16x16xf32>
    %141 = tpu.matmul %140, %128, %cst_38 {dimension_numbers = #tpu.dot_dimension_numbers<[2], [1], [1], [2], [0, 0, 0, 1, 1, 2], [0], [0]>} : vector<1x16x16xbf16>, vector<1x16x16xbf16>, vector<1x16x16xf32> -> vector<1x16x16xf32>
    "tpu.trace_stop"() : () -> ()
    %142 = tpu.concatenate %78, %99, %120, %141 in 2 : vector<1x16x16xf32>, vector<1x16x16xf32>, vector<1x16x16xf32>, vector<1x16x16xf32> -> vector<1x16x64xf32>
    %143 = vector.shape_cast %142 : vector<1x16x64xf32> to vector<16x64xf32>
    %144 = arith.truncf %143 : vector<16x64xf32> to vector<16x64xbf16>
    %c0_39 = arith.constant 0 : index
    %c0_40 = arith.constant 0 : index
    %c0_41 = arith.constant 0 : index
    %145 = vector.load %arg8[%c0_39, %c0_40, %c0_41] : memref<1x64x64xbf16, #tpu.memory_space<vmem>>, vector<1x64x64xbf16>
    %146 = vector.shape_cast %145 : vector<1x64x64xbf16> to vector<64x64xbf16>
    %cst_42 = arith.constant dense<0.000000e+00> : vector<16x64xf32>
    %147 = tpu.matmul %144, %146, %cst_42 {dimension_numbers = #tpu.dot_dimension_numbers<[1], [0], [0], [1], [0, 0, 1, 1], [], []>} : vector<16x64xbf16>, vector<64x64xbf16>, vector<16x64xf32> -> vector<16x64xf32>
    %c0_43 = arith.constant 0 : index
    %c0_44 = arith.constant 0 : index
    %c256 = arith.constant 256 : index
    %148 = vector.load %arg11[%c0_43, %c0_44, %c256] : memref<1x1x768xf32, #tpu.memory_space<vmem>>, vector<1x1x64xf32>
    %149 = vector.shape_cast %148 : vector<1x1x64xf32> to vector<1x64xf32>
    %150 = vector.broadcast %149 : vector<1x64xf32> to vector<16x64xf32>
    %151 = arith.addf %147, %150 : vector<16x64xf32>
    %152 = vector.shape_cast %151 : vector<16x64xf32> to vector<1x16x64xf32>
    %153 = vector.broadcast %14 : vector<1x1x64xf32> to vector<1x16x64xf32>
    %154 = arith.mulf %153, %152 : vector<1x16x64xf32>
    %155 = arith.addf %3, %154 : vector<1x16x64xf32>
    %cst_45 = arith.constant dense<0.000000e+00> : vector<1x16xf32>
    %156 = vector.multi_reduction <add>, %155, %cst_45 [2] : vector<1x16x64xf32> to vector<1x16xf32>
    %157 = vector.shape_cast %156 : vector<1x16xf32> to vector<1x16x1xf32>
    %cst_46 = arith.constant 6.400000e+01 : f32
    %158 = vector.broadcast %cst_46 : f32 to vector<1x16x1xf32>
    %159 = arith.divf %157, %158 : vector<1x16x1xf32>
    %160 = vector.broadcast %159 : vector<1x16x1xf32> to vector<1x16x64xf32>
    %161 = arith.subf %155, %160 : vector<1x16x64xf32>
    %162 = arith.mulf %161, %161 : vector<1x16x64xf32>
    %cst_47 = arith.constant dense<0.000000e+00> : vector<1x16xf32>
    %163 = vector.multi_reduction <add>, %162, %cst_47 [2] : vector<1x16x64xf32> to vector<1x16xf32>
    %164 = vector.shape_cast %163 : vector<1x16xf32> to vector<1x16x1xf32>
    %cst_48 = arith.constant 6.400000e+01 : f32
    %165 = vector.broadcast %cst_48 : f32 to vector<1x16x1xf32>
    %166 = arith.divf %164, %165 : vector<1x16x1xf32>
    %167 = vector.broadcast %159 : vector<1x16x1xf32> to vector<1x16x64xf32>
    %168 = arith.subf %155, %167 : vector<1x16x64xf32>
    %cst_49 = arith.constant 9.99999997E-7 : f32
    %169 = vector.broadcast %cst_49 : f32 to vector<1x16x1xf32>
    %170 = arith.addf %166, %169 : vector<1x16x1xf32>
    %171 = math.rsqrt %170 : vector<1x16x1xf32>
    %172 = vector.broadcast %171 : vector<1x16x1xf32> to vector<1x16x64xf32>
    %173 = arith.mulf %168, %172 : vector<1x16x64xf32>
    %cst_50 = arith.constant 1.000000e+00 : f32
    %174 = vector.broadcast %cst_50 : f32 to vector<1x1x64xf32>
    %175 = arith.addf %174, %20 : vector<1x1x64xf32>
    %176 = vector.broadcast %175 : vector<1x1x64xf32> to vector<1x16x64xf32>
    %177 = arith.mulf %173, %176 : vector<1x16x64xf32>
    %178 = vector.broadcast %17 : vector<1x1x64xf32> to vector<1x16x64xf32>
    %179 = arith.addf %177, %178 : vector<1x16x64xf32>
    %180 = vector.shape_cast %179 : vector<1x16x64xf32> to vector<16x64xf32>
    %181 = arith.truncf %180 : vector<16x64xf32> to vector<16x64xbf16>
    %c0_51 = arith.constant 0 : index
    %c0_52 = arith.constant 0 : index
    %c0_53 = arith.constant 0 : index
    %182 = vector.load %arg9[%c0_51, %c0_52, %c0_53] : memref<1x64x256xbf16, #tpu.memory_space<vmem>>, vector<1x64x256xbf16>
    %183 = vector.shape_cast %182 : vector<1x64x256xbf16> to vector<64x256xbf16>
    %cst_54 = arith.constant dense<0.000000e+00> : vector<16x256xf32>
    %184 = tpu.matmul %181, %183, %cst_54 {dimension_numbers = #tpu.dot_dimension_numbers<[1], [0], [0], [1], [0, 0, 1, 1], [], []>} : vector<16x64xbf16>, vector<64x256xbf16>, vector<16x256xf32> -> vector<16x256xf32>
    %c0_55 = arith.constant 0 : index
    %c0_56 = arith.constant 0 : index
    %c384 = arith.constant 384 : index
    %185 = vector.load %arg11[%c0_55, %c0_56, %c384] : memref<1x1x768xf32, #tpu.memory_space<vmem>>, vector<1x1x256xf32>
    %186 = vector.shape_cast %185 : vector<1x1x256xf32> to vector<1x256xf32>
    %187 = vector.broadcast %186 : vector<1x256xf32> to vector<16x256xf32>
    %188 = arith.addf %184, %187 : vector<16x256xf32>
    %cst_57 = arith.constant 5.000000e-01 : f32
    %189 = vector.broadcast %cst_57 : f32 to vector<16x256xf32>
    %190 = arith.mulf %189, %188 : vector<16x256xf32>
    %cst_58 = arith.constant 0.636619746 : f32
    %191 = math.sqrt %cst_58 : f32
    %cst_59 = arith.constant 4.471500e-02 : f32
    %192 = vector.broadcast %cst_59 : f32 to vector<16x256xf32>
    %193 = arith.mulf %192, %188 : vector<16x256xf32>
    %194 = arith.mulf %193, %188 : vector<16x256xf32>
    %195 = arith.mulf %194, %188 : vector<16x256xf32>
    %196 = arith.addf %188, %195 : vector<16x256xf32>
    %197 = vector.broadcast %191 : f32 to vector<16x256xf32>
    %198 = arith.mulf %197, %196 : vector<16x256xf32>
    %199 = math.tanh %198 : vector<16x256xf32>
    %cst_60 = arith.constant 1.000000e+00 : f32
    %200 = vector.broadcast %cst_60 : f32 to vector<16x256xf32>
    %201 = arith.addf %200, %199 : vector<16x256xf32>
    %202 = arith.mulf %190, %201 : vector<16x256xf32>
    %203 = arith.truncf %202 : vector<16x256xf32> to vector<16x256xbf16>
    %c0_61 = arith.constant 0 : index
    %c0_62 = arith.constant 0 : index
    %c0_63 = arith.constant 0 : index
    %204 = vector.load %arg10[%c0_61, %c0_62, %c0_63] : memref<1x256x64xbf16, #tpu.memory_space<vmem>>, vector<1x256x64xbf16>
    %205 = vector.shape_cast %204 : vector<1x256x64xbf16> to vector<256x64xbf16>
    %cst_64 = arith.constant dense<0.000000e+00> : vector<16x64xf32>
    %206 = tpu.matmul %203, %205, %cst_64 {dimension_numbers = #tpu.dot_dimension_numbers<[1], [0], [0], [1], [0, 0, 1, 1], [], []>} : vector<16x256xbf16>, vector<256x64xbf16>, vector<16x64xf32> -> vector<16x64xf32>
    %c0_65 = arith.constant 0 : index
    %c0_66 = arith.constant 0 : index
    %c640 = arith.constant 640 : index
    %207 = vector.load %arg11[%c0_65, %c0_66, %c640] : memref<1x1x768xf32, #tpu.memory_space<vmem>>, vector<1x1x64xf32>
    %208 = vector.shape_cast %207 : vector<1x1x64xf32> to vector<1x64xf32>
    %209 = vector.broadcast %208 : vector<1x64xf32> to vector<16x64xf32>
    %210 = arith.addf %206, %209 : vector<16x64xf32>
    %211 = vector.shape_cast %210 : vector<16x64xf32> to vector<1x16x64xf32>
    %212 = vector.broadcast %23 : vector<1x1x64xf32> to vector<1x16x64xf32>
    %213 = arith.mulf %212, %211 : vector<1x16x64xf32>
    %214 = arith.addf %155, %213 : vector<1x16x64xf32>
    %c0_67 = arith.constant 0 : index
    %c0_68 = arith.constant 0 : index
    %c0_69 = arith.constant 0 : index
    %215 = vector.load %arg15[%c0_67, %c0_68, %c0_69] : memref<1x16x64xf32, #tpu.memory_space<vmem>>, vector<1x16x64xf32>
    tpu.vector_store %arg15[%c0_67, %c0_68, %c0_69], %214 {strides = array<i32>} : memref<1x16x64xf32, #tpu.memory_space<vmem>>, vector<1x16x64xf32>,
    %c1_i32 = arith.constant 1 : i32
    %216 = arith.cmpi eq, %arg1, %c1_i32 : i32
    %217 = arith.extui %216 : i1 to i32
    %c0_i32_70 = arith.constant 0 : i32
    %218 = arith.cmpi ne, %217, %c0_i32_70 : i32
    scf.if %218 {
      %c0_71 = arith.constant 0 : index
      %c0_72 = arith.constant 0 : index
      %c0_73 = arith.constant 0 : index
      %219 = vector.load %arg6[%c0_71, %c0_72, %c0_73] : memref<1x2x64xf32, #tpu.memory_space<vmem>>, vector<1x1x64xf32>
      %220 = vector.shape_cast %219 : vector<1x1x64xf32> to vector<1x64xf32>
      %221 = vector.shape_cast %220 : vector<1x64xf32> to vector<1x1x64xf32>
      %c0_74 = arith.constant 0 : index
      %c1 = arith.constant 1 : index
      %c0_75 = arith.constant 0 : index
      %222 = vector.load %arg6[%c0_74, %c1, %c0_75] : memref<1x2x64xf32, #tpu.memory_space<vmem>>, vector<1x1x64xf32>
      %223 = vector.shape_cast %222 : vector<1x1x64xf32> to vector<1x64xf32>
      %224 = vector.shape_cast %223 : vector<1x64xf32> to vector<1x1x64xf32>
      %cst_76 = arith.constant dense<0.000000e+00> : vector<1x16xf32>
      %225 = vector.multi_reduction <add>, %214, %cst_76 [2] : vector<1x16x64xf32> to vector<1x16xf32>
      %226 = vector.shape_cast %225 : vector<1x16xf32> to vector<1x16x1xf32>
      %cst_77 = arith.constant 6.400000e+01 : f32
      %227 = vector.broadcast %cst_77 : f32 to vector<1x16x1xf32>
      %228 = arith.divf %226, %227 : vector<1x16x1xf32>
      %229 = vector.broadcast %228 : vector<1x16x1xf32> to vector<1x16x64xf32>
      %230 = arith.subf %214, %229 : vector<1x16x64xf32>
      %231 = arith.mulf %230, %230 : vector<1x16x64xf32>
      %cst_78 = arith.constant dense<0.000000e+00> : vector<1x16xf32>
      %232 = vector.multi_reduction <add>, %231, %cst_78 [2] : vector<1x16x64xf32> to vector<1x16xf32>
      %233 = vector.shape_cast %232 : vector<1x16xf32> to vector<1x16x1xf32>
      %cst_79 = arith.constant 6.400000e+01 : f32
      %234 = vector.broadcast %cst_79 : f32 to vector<1x16x1xf32>
      %235 = arith.divf %233, %234 : vector<1x16x1xf32>
      %236 = vector.broadcast %228 : vector<1x16x1xf32> to vector<1x16x64xf32>
      %237 = arith.subf %214, %236 : vector<1x16x64xf32>
      %cst_80 = arith.constant 9.99999997E-7 : f32
      %238 = vector.broadcast %cst_80 : f32 to vector<1x16x1xf32>
      %239 = arith.addf %235, %238 : vector<1x16x1xf32>
      %240 = math.rsqrt %239 : vector<1x16x1xf32>
      %241 = vector.broadcast %240 : vector<1x16x1xf32> to vector<1x16x64xf32>
      %242 = arith.mulf %237, %241 : vector<1x16x64xf32>
      %cst_81 = arith.constant 1.000000e+00 : f32
      %243 = vector.broadcast %cst_81 : f32 to vector<1x1x64xf32>
      %244 = arith.addf %243, %221 : vector<1x1x64xf32>
      %245 = vector.broadcast %244 : vector<1x1x64xf32> to vector<1x16x64xf32>
      %246 = arith.mulf %242, %245 : vector<1x16x64xf32>
      %247 = vector.broadcast %224 : vector<1x1x64xf32> to vector<1x16x64xf32>
      %248 = arith.addf %246, %247 : vector<1x16x64xf32>
      %249 = vector.shape_cast %248 : vector<1x16x64xf32> to vector<16x64xf32>
      %250 = arith.truncf %249 : vector<16x64xf32> to vector<16x64xbf16>
      %c0_82 = arith.constant 0 : index
      %c0_83 = arith.constant 0 : index
      %251 = vector.load %arg12[%c0_82, %c0_83] : memref<64x128xbf16, #tpu.memory_space<vmem>>, vector<64x128xbf16>
      %cst_84 = arith.constant dense<0.000000e+00> : vector<16x128xf32>
      %252 = tpu.matmul %250, %251, %cst_84 {dimension_numbers = #tpu.dot_dimension_numbers<[1], [0], [0], [1], [0, 0, 1, 1], [], []>} : vector<16x64xbf16>, vector<64x128xbf16>, vector<16x128xf32> -> vector<16x128xf32>
      %c0_85 = arith.constant 0 : index
      %c0_86 = arith.constant 0 : index
      %253 = vector.load %arg13[%c0_85, %c0_86] : memref<1x128xf32, #tpu.memory_space<vmem>>, vector<1x128xf32>
      %254 = vector.broadcast %253 : vector<1x128xf32> to vector<16x128xf32>
      %255 = arith.addf %252, %254 : vector<16x128xf32>
      %c0_87 = arith.constant 0 : index
      %c0_88 = arith.constant 0 : index
      %256 = vector.load %arg14[%c0_87, %c0_88] : memref<16x128xf32, #tpu.memory_space<vmem>>, vector<16x128xf32>
      tpu.vector_store %arg14[%c0_87, %c0_88], %255 {strides = array<i32>} : memref<16x128xf32, #tpu.memory_space<vmem>>, vector<16x128xf32>,
    } else {
    }
    return
  }
  func.func @transform_0(%arg0: i32, %arg1: i32) -> (i32, i32, i32) {
    %c0_i32 = arith.constant 0 : i32
    %c0_i32_0 = arith.constant 0 : i32
    %c0_i32_1 = arith.constant 0 : i32
    return %arg0, %c0_i32, %c0_i32_0 : i32, i32, i32
  }
  func.func @transform_1(%arg0: i32, %arg1: i32) -> (i32, i32) {
    %c0_i32 = arith.constant 0 : i32
    %c0_i32_0 = arith.constant 0 : i32
    %c0_i32_1 = arith.constant 0 : i32
    return %c0_i32, %c0_i32_0 : i32, i32
  }
  func.func @transform_2(%arg0: i32, %arg1: i32) -> (i32, i32) {
    %c0_i32 = arith.constant 0 : i32
    %c0_i32_0 = arith.constant 0 : i32
    %c0_i32_1 = arith.constant 0 : i32
    return %c0_i32, %c0_i32_0 : i32, i32
  }
  func.func @transform_3(%arg0: i32, %arg1: i32) -> (i32, i32, i32, i32) {
    %c0_i32 = arith.constant 0 : i32
    %c0_i32_0 = arith.constant 0 : i32
    %c0_i32_1 = arith.constant 0 : i32
    return %arg0, %arg1, %c0_i32, %c0_i32_0 : i32, i32, i32, i32
  }
  func.func @transform_4(%arg0: i32, %arg1: i32) -> (i32, i32, i32) {
    %c0_i32 = arith.constant 0 : i32
    %c0_i32_0 = arith.constant 0 : i32
    %c0_i32_1 = arith.constant 0 : i32
    return %arg0, %c0_i32, %c0_i32_0 : i32, i32, i32
  }
  func.func @transform_5(%arg0: i32, %arg1: i32) -> (i32, i32, i32) {
    %c0_i32 = arith.constant 0 : i32
    %c0_i32_0 = arith.constant 0 : i32
    %c0_i32_1 = arith.constant 0 : i32
    return %arg1, %c0_i32, %c0_i32_0 : i32, i32, i32
  }
  func.func @transform_6(%arg0: i32, %arg1: i32) -> (i32, i32, i32) {
    %c0_i32 = arith.constant 0 : i32
    %c0_i32_0 = arith.constant 0 : i32
    %c0_i32_1 = arith.constant 0 : i32
    return %arg1, %c0_i32, %c0_i32_0 : i32, i32, i32
  }
  func.func @transform_7(%arg0: i32, %arg1: i32) -> (i32, i32, i32) {
    %c0_i32 = arith.constant 0 : i32
    %c0_i32_0 = arith.constant 0 : i32
    %c0_i32_1 = arith.constant 0 : i32
    return %arg1, %c0_i32, %c0_i32_0 : i32, i32, i32
  }
  func.func @transform_8(%arg0: i32, %arg1: i32) -> (i32, i32, i32) {
    %c0_i32 = arith.constant 0 : i32
    %c0_i32_0 = arith.constant 0 : i32
    %c0_i32_1 = arith.constant 0 : i32
    return %arg1, %c0_i32, %c0_i32_0 : i32, i32, i32
  }
  func.func @transform_9(%arg0: i32, %arg1: i32) -> (i32, i32, i32) {
    %c0_i32 = arith.constant 0 : i32
    %c0_i32_0 = arith.constant 0 : i32
    %c0_i32_1 = arith.constant 0 : i32
    return %arg1, %c0_i32, %c0_i32_0 : i32, i32, i32
  }
  func.func @transform_10(%arg0: i32, %arg1: i32) -> (i32, i32) {
    %c0_i32 = arith.constant 0 : i32
    %c0_i32_0 = arith.constant 0 : i32
    %c0_i32_1 = arith.constant 0 : i32
    return %c0_i32, %c0_i32_0 : i32, i32
  }
  func.func @transform_11(%arg0: i32, %arg1: i32) -> (i32, i32) {
    %c0_i32 = arith.constant 0 : i32
    %c0_i32_0 = arith.constant 0 : i32
    %c0_i32_1 = arith.constant 0 : i32
    return %c0_i32, %c0_i32_0 : i32, i32
  }
  func.func @transform_12(%arg0: i32, %arg1: i32) -> (i32, i32) {
    %c0_i32 = arith.constant 0 : i32
    %c0_i32_0 = arith.constant 0 : i32
    return %arg0, %c0_i32 : i32, i32
  }
}

</mosaic_0001>

<bundles_post_ra>
// kernel: dit_forward_pallas.2
= control target key start
LH: loop header
LB: loop body
LE: loop exit
PB: predicated region body
PF: predicated region fallthrough
CT: control target
= control target key end

     0   :  { %v894_v53 = vmov 0.0|0.0   ;;  %vm895_vm0 = vmmov 0   ;;  %v896_v63 = vmov 0.0   ;;  %vm169_vm1 = vcmask 523264   ;;  %s1264_s1 = inlined_call_operand.vmem [shape: f32[256,64], index: 1, kind: input, shape index: {}]   ;;  %s1265_s0 = inlined_call_operand.vmem [shape: f32[2,256], index: 0, kind: input, shape index: {}]   ;;  %s1266_s3 = inlined_call_operand.vmem [shape: f32[64,64], index: 3, kind: input, shape index: {}]   ;;  %s1267_s2 = inlined_call_operand.vmem [shape: f32[1,64], index: 2, kind: input, shape index: {}]   ;;  %s1268_s5 = inlined_call_operand.vmem [shape: f32[64,896], index: 5, kind: input, shape index: {}]   ;;  %s1269_s4 = inlined_call_operand.vmem [shape: f32[1,64], index: 4, kind: input, shape index: {}]   ;;  %s1270_s6 = inlined_call_operand.vmem [shape: f32[1,896], index: 6, kind: input, shape index: {}]   ;;  %s1271_s7 = inlined_call_operand.vmem [shape: f32[2,896], index: 7, kind: output, shape index: {}]  }
   0x1   :  { %v43_v0 = vld [vmem:[%s1264_s1 + $0x80] sm:$0xff]  ;;  %v44_v1 = vld [vmem:[%s1264_s1 + $0x88] sm:$0xff]  ;;  %v45_v5 = vld [vmem:[%s1264_s1 + $0x90] sm:$0xff]  ;;  %810 = vmatprep.subr.bf16.mxu1 %v894_v53  ;;  %756 = vmatprep.mubr.msk.f32.mxu1 %vm895_vm0, %v896_v63 }
   0x2   :  { %v27_v2 = vld [vmem:[%s1264_s1] sm:$0xff]  ;;  %v778_v3 = vpack.c.bf16 %v44_v1, %v43_v0  ;;  %v28_v4 = vld [vmem:[%s1264_s1 + $0x8] sm:$0xff]  ;;  %v46_v6 = vld [vmem:[%s1264_s1 + $0x98] sm:$0xff] }
   0x3   :  { %v780_v7 = vpack.c.bf16 %v28_v4, %v27_v2  ;;  %v782_v8 = vpack.c.bf16 %v46_v6, %v45_v5  ;;  %v29_v9 = vld [vmem:[%s1264_s1 + $0x10] sm:$0xff]  ;;  %v30_v10 = vld [vmem:[%s1264_s1 + $0x18] sm:$0xff]  ;;  %v47_v11 = vld [vmem:[%s1264_s1 + $0xa0] sm:$0xff] }
   0x4   :  { %779 = vmatprep.subr.bf16.mxu0 %v778_v3  ;;  %v48_v12 = vld [vmem:[%s1264_s1 + $0xa8] sm:$0xff]  ;;  %v784_v13 = vpack.c.bf16 %v30_v10, %v29_v9  ;;  %v31_v15 = vld [vmem:[%s1264_s1 + $0x20] sm:$0xff]  ;;  %v49_v17 = vld [vmem:[%s1264_s1 + $0xb0] sm:$0xff] }
   0x5   :  { %781 = vmatpush3.bf16.msra.mxu0 %v780_v7  ;;  %v786_v14 = vpack.c.bf16 %v48_v12, %v47_v11  ;;  %v32_v16 = vld [vmem:[%s1264_s1 + $0x28] sm:$0xff]  ;;  %v50_v18 = vld [vmem:[%s1264_s1 + $0xb8] sm:$0xff]  ;;  %v33_v21 = vld [vmem:[%s1264_s1 + $0x30] sm:$0xff] }
   0x6   :  { %783 = vmatprep.subr.bf16.mxu0 %v782_v8  ;;  %v788_v19 = vpack.c.bf16 %v32_v16, %v31_v15  ;;  %v790_v20 = vpack.c.bf16 %v50_v18, %v49_v17  ;;  %v34_v22 = vld [vmem:[%s1264_s1 + $0x38] sm:$0xff]  ;;  %v51_v23 = vld [vmem:[%s1264_s1 + $0xc0] sm:$0xff]  ;;  %v52_v24 = vld [vmem:[%s1264_s1 + $0xc8] sm:$0xff] }
   0x7   :  { %v678_v25 = vld.sshfl [vmem:[%s1265_s0] sm:$0x33 pattern:$0x76325410]  ;;  %v792_v27 = vpack.c.bf16 %v34_v22, %v33_v21  ;;  %v794_v28 = vpack.c.bf16 %v52_v24, %v51_v23  ;;  %v36_v30 = vld [vmem:[%s1264_s1 + $0x48] sm:$0xff]  ;;  %v53_v31 = vld [vmem:[%s1264_s1 + $0xd0] sm:$0xff] }
   0x8   :  { %v74_v26 = vcombine.high %v678_v25, %v678_v25  ;;  %v35_v29 = vld [vmem:[%s1264_s1 + $0x40] sm:$0xff]  ;;  %v54_v32 = vld [vmem:[%s1264_s1 + $0xd8] sm:$0xff]  ;;  %v37_v35 = vld [vmem:[%s1264_s1 + $0x50] sm:$0xff] }
   0x9   :  { %785 = vmatpush3.bf16.msra.mxu0 %v784_v13  ;;  %v796_v33 = vpack.c.bf16 %v36_v30, %v35_v29  ;;  %v798_v34 = vpack.c.bf16 %v54_v32, %v53_v31  ;;  %v38_v36 = vld [vmem:[%s1264_s1 + $0x58] sm:$0xff]  ;;  %v55_v37 = vld [vmem:[%s1264_s1 + $0xe0] sm:$0xff]  ;;  %v56_v38 = vld [vmem:[%s1264_s1 + $0xe8] sm:$0xff] }
   0xa   :  { %787 = vmatprep.subr.bf16.mxu0 %v786_v14  ;;  %141 = vmatprep.mubr.f32.mxu0 %v74_v26  ;;  %v800_v39 = vpack.c.bf16 %v38_v36, %v37_v35  ;;  %v802_v40 = vpack.c.bf16 %v56_v38, %v55_v37  ;;  %v39_v41 = vld [vmem:[%s1264_s1 + $0x60] sm:$0xff]  ;;  %v40_v42 = vld [vmem:[%s1264_s1 + $0x68] sm:$0xff]  ;;  %v57_v43 = vld [vmem:[%s1264_s1 + $0xf0] sm:$0xff] }
   0xb   :  { %v58_v44 = vld [vmem:[%s1264_s1 + $0xf8] sm:$0xff]  ;;  %v804_v45 = vpack.c.bf16 %v40_v42, %v39_v41  ;;  %v41_v47 = vld [vmem:[%s1264_s1 + $0x70] sm:$0xff]  ;;  %v154_v50 = vld [vmem:[%s1266_s3] sm:$0xff] }
   0xc   :  { %v806_v46 = vpack.c.bf16 %v58_v44, %v57_v43  ;;  %v42_v48 = vld [vmem:[%s1264_s1 + $0x78] sm:$0xff]  ;;  %v155_v51 = vld [vmem:[%s1266_s3 + $0x8] sm:$0xff]  ;;  %v156_v54 = vld [vmem:[%s1266_s3 + $0x10] sm:$0xff] }
   0xd   :  { %789 = vmatpush3.bf16.msra.mxu0 %v788_v19  ;;  %v808_v49 = vpack.c.bf16 %v42_v48, %v41_v47  ;;  %v811_v52 = vpack.c.bf16 %v155_v51, %v154_v50  ;;  %v157_v55 = vld [vmem:[%s1266_s3 + $0x18] sm:$0xff]  ;;  %v158_v57 = vld [vmem:[%s1266_s3 + $0x20] sm:$0xff]  ;;  %v159_v58 = vld [vmem:[%s1266_s3 + $0x28] sm:$0xff] }
   0xe   :  { %791 = vmatprep.subr.bf16.mxu0 %v790_v20  ;;  %v814_v56 = vpack.c.bf16 %v157_v55, %v156_v54  ;;  %v817_v59 = vpack.c.bf16 %v159_v58, %v158_v57  ;;  %v160_v60 = vld [vmem:[%s1266_s3 + $0x30] sm:$0xff]  ;;  %v161_v61 = vld [vmem:[%s1266_s3 + $0x38] sm:$0xff]  ;;  %v677_v1 = vld [vmem:[%s1267_s2] ss:$0 sm:$0xff] }
   0xf   :  { %812 = vmatpush3.bf16.msra.mxu1 %v811_v52  ;;  %v820_v62 = vpack.c.bf16 %v161_v61, %v160_v60  ;;  %v251_v10 = vld [vmem:[%s1268_s5 + $0x8] sm:$0xff]  ;;  %v258_v11 = vld [vmem:[%s1268_s5 + $0x40] sm:$0xff]  ;;  %v253_v12 = vld [vmem:[%s1268_s5 + $0x18] sm:$0xff] }
  0x10   :  { %813 = vmatprep.subr.bf16.mxu1 %v894_v53  ;;  %v822_v13 = vpack.c.bf16 %v258_v11, %v251_v10  ;;  %v260_v14 = vld [vmem:[%s1268_s5 + $0x50] sm:$0xff]  ;;  %v250_v15 = vld [vmem:[%s1268_s5] sm:$0xff]  ;;  %v257_v16 = vld [vmem:[%s1268_s5 + $0x38] sm:$0xff] }
  0x11   :  { %793 = vmatpush3.bf16.msra.mxu0 %v792_v27  ;;  %v838_v17 = vpack.c.bf16 %v260_v14, %v253_v12  ;;  %v824_v18 = vpack.c.bf16 %v257_v16, %v250_v15  ;;  %v252_v19 = vld [vmem:[%s1268_s5 + $0x10] sm:$0xff]  ;;  %v259_v20 = vld [vmem:[%s1268_s5 + $0x48] sm:$0xff]  ;;  %v265_v22 = vld [vmem:[%s1268_s5 + $0x78] sm:$0xff] }
  0x12   :  { %795 = vmatprep.subr.bf16.mxu0 %v794_v28  ;;  %v840_v21 = vpack.c.bf16 %v259_v20, %v252_v19  ;;  %v272_v23 = vld [vmem:[%s1268_s5 + $0xb0] sm:$0xff]  ;;  %v267_v24 = vld [vmem:[%s1268_s5 + $0x88] sm:$0xff]  ;;  %v274_v26 = vld [vmem:[%s1268_s5 + $0xc0] sm:$0xff] }
  0x13   :  { %815 = vmatpush3.bf16.msra.mxu1 %v814_v56  ;;  %v264_v27 = vld [vmem:[%s1268_s5 + $0x70] sm:$0xff]  ;;  %v271_v28 = vld [vmem:[%s1268_s5 + $0xa8] sm:$0xff]  ;;  %v842_v29 = vpack.c.bf16 %v274_v26, %v267_v24  ;;  %v266_v31 = vld [vmem:[%s1268_s5 + $0x80] sm:$0xff] }
  0x14   :  { %816 = vmatprep.subr.bf16.mxu1 %v894_v53  ;;  %v828_v30 = vpack.c.bf16 %v271_v28, %v264_v27  ;;  %v273_v32 = vld [vmem:[%s1268_s5 + $0xb8] sm:$0xff]  ;;  %v286_v35 = vld [vmem:[%s1268_s5 + $0x120] sm:$0xff]  ;;  %v288_v38 = vld [vmem:[%s1268_s5 + $0x130] sm:$0xff] }
  0x15   :  { %797 = vmatpush3.bf16.msra.mxu0 %v796_v33  ;;  %v844_v33 = vpack.c.bf16 %v273_v32, %v266_v31  ;;  %v281_v36 = vld [vmem:[%s1268_s5 + $0xf8] sm:$0xff]  ;;  %v280_v43 = vld [vmem:[%s1268_s5 + $0xf0] sm:$0xff]  ;;  %v287_v44 = vld [vmem:[%s1268_s5 + $0x128] sm:$0xff] }
  0x16   :  { %799 = vmatprep.subr.bf16.mxu0 %v798_v34  ;;  %v279_v34 = vld [vmem:[%s1268_s5 + $0xe8] sm:$0xff]  ;;  %v846_v41 = vpack.c.bf16 %v288_v38, %v281_v36  ;;  %v300_v47 = vld [vmem:[%s1268_s5 + $0x190] sm:$0xff]  ;;  %v302_v50 = vld [vmem:[%s1268_s5 + $0x1a0] sm:$0xff] }
  0x17   :  { %818 = vmatpush3.bf16.msra.mxu1 %v817_v59  ;;  %v830_v37 = vpack.c.bf16 %v286_v35, %v279_v34  ;;  %v295_v48 = vld [vmem:[%s1268_s5 + $0x168] sm:$0xff]  ;;  %v292_v51 = vld [vmem:[%s1268_s5 + $0x150] sm:$0xff]  ;;  %v294_v56 = vld [vmem:[%s1268_s5 + $0x160] sm:$0xff] }
  0x18   :  { %819 = vmatprep.subr.bf16.mxu1 %v894_v53  ;;  %v299_v52 = vld [vmem:[%s1268_s5 + $0x188] sm:$0xff]  ;;  %v850_v54 = vpack.c.bf16 %v302_v50, %v295_v48  ;;  %v301_v57 = vld [vmem:[%s1268_s5 + $0x198] sm:$0xff]  ;;  %v262_v60 = vld [vmem:[%s1268_s5 + $0x60] sm:$0xff] }
  0x19   :  { %801 = vmatpush3.bf16.msra.mxu0 %v800_v39  ;;  %v278_v39 = vld [vmem:[%s1268_s5 + $0xe0] sm:$0xff]  ;;  %v836_v55 = vpack.c.bf16 %v299_v52, %v292_v51  ;;  %v852_v58 = vpack.c.bf16 %v301_v57, %v294_v56  ;;  %v255_v59 = vld [vmem:[%s1268_s5 + $0x28] sm:$0xff]  ;;  %v269_v10 = vld [vmem:[%s1268_s5 + $0x98] sm:$0xff] }
  0x1a   :  { %803 = vmatprep.subr.bf16.mxu0 %v802_v40  ;;  %v285_v40 = vld [vmem:[%s1268_s5 + $0x118] sm:$0xff]  ;;  %v854_v61 = vpack.c.bf16 %v262_v60, %v255_v59  ;;  %v276_v11 = vld [vmem:[%s1268_s5 + $0xd0] sm:$0xff]  ;;  %v270_v19 = vld [vmem:[%s1268_s5 + $0xa0] sm:$0xff] }
  0x1b   :  { %821 = vmatpush3.bf16.msra.mxu1 %v820_v62  ;;  %v832_v42 = vpack.c.bf16 %v285_v40, %v278_v39  ;;  %v680_v62 = vld [vmem:[%s1269_s4] ss:$0 sm:$0xff]  ;;  %v268_v15 = vld [vmem:[%s1268_s5 + $0x90] sm:$0xff]  ;;  %v277_v20 = vld [vmem:[%s1268_s5 + $0xd8] sm:$0xff]  ;;  %v308_v40 = vlaneseq }
  0x1c   :  { %823 = vmatprep.subr.bf16.mxu1 %v822_v13  ;;  %v874_v24 = vpack.c.bf16 %v277_v20, %v270_v19  ;;  %v289_v27 = vld [vmem:[%s1268_s5 + $0x138] sm:$0xff]  ;;  %v284_v28 = vld [vmem:[%s1268_s5 + $0x110] sm:$0xff]  ;;  %v303_v36 = vld [vmem:[%s1268_s5 + $0x1a8] sm:$0xff] }
  0x1d   :  { %805 = vmatpush3.bf16.msra.mxu0 %v804_v45  ;;  %v848_v45 = vpack.c.bf16 %v287_v44, %v280_v43  ;;  %v304_v31 = vld [vmem:[%s1268_s5 + $0x1b0] sm:$0xff]  ;;  %v306_v44 = vld [vmem:[%s1270_s6] sm:$0xff] }
  0x1e   :  { %807 = vmatprep.subr.bf16.mxu0 %v806_v46  ;;  %v293_v46 = vld [vmem:[%s1268_s5 + $0x158] sm:$0xff]  ;;  %v296_v34 = vld [vmem:[%s1268_s5 + $0x170] sm:$0xff] }
  0x1f   :  { %v868_v38 = vpack.c.bf16 %v303_v36, %v296_v34 }
  0x21   :  { %809 = vmatpush3.bf16.msra.mxu0 %v808_v49  ;;  %v834_v49 = vpack.c.bf16 %v300_v47, %v293_v46  ;;  %v897_v46 = vmov 1983009808  }
  0x22   :  { %839 = vmatprep.subr.bf16.mxu0 %v838_v17  ;;  %v858_v17 = vpack.c.bf16 %v276_v11, %v269_v10  ;;  %v639_v47 = vunpack.c.l.s4 %v897_v46 }
  0x24   :  { %142 = vmatmul.mubr.f32.vlgmr.msra.gmra.mrb[0].mxu0 %v678_v25  ;;  %v826_v25 = vpack.c.bf16 %v272_v23, %v265_v22  ;;  %v290_v22 = vld [vmem:[%s1268_s5 + $0x140] sm:$0xff]  ;;  %v640_v51 = vunpack.c.0.s8 %v639_v47 }
  0x25   :  { %481 = vmatprep.mubr.f32.mxu0 %v896_v63  ;;  %841 = vmatpush1.bf16.msra.mxu0 %v840_v21  ;;  %v283_v21 = vld [vmem:[%s1268_s5 + $0x108] sm:$0xff] }
  0x26   :  { %843 = vmatprep.subr.bf16.mxu0 %v842_v29  ;;  %v862_v26 = vpack.c.bf16 %v290_v22, %v283_v21  ;;  %v291_v29 = vld [vmem:[%s1268_s5 + $0x148] sm:$0xff] }
  0x29   :  { %845 = vmatpush1.bf16.msra.mxu0 %v844_v33  ;;  %v877_v33 = vpack.c.bf16 %v291_v29, %v284_v28 }
  0x2a   :  { %847 = vmatprep.subr.bf16.mxu0 %v846_v41  ;;  %v309_v41 = vshrl.u32 %v308_v40, 7 }
  0x2c   :  { %v318_v43 = vsub.s32 2, %v309_v41  ;;  %v322_v48 = vsub.s32 3, %v309_v41 }
  0x2d   :  { %849 = vmatpush1.bf16.msra.mxu0 %v848_v45  ;;  %v314_v45 = vsub.s32 1, %v309_v41 }
  0x2e   :  { %851 = vmatprep.subr.bf16.mxu0 %v850_v54  ;;  %v323_v52 = vrot.slane %v306_v44, %v322_v48 }
  0x2f   :  { %v315_v50 = vrot.slane %v306_v44, %v314_v45 }
  0x31   :  { %853 = vmatpush1.bf16.msra.mxu0 %v852_v58 }
  0x32   :  { %870 = vmatprep.subr.bf16.mxu0 %v894_v53 }
  0xf7   :  { %v719_v0 = vpop.f32.mrb[0].mxu0 }
  0xf8   :  { %v720_v2 = vpop.f32.mrb[1].mxu0 }
  0xf9   :  { %v721_v3 = vadd.f32 %v720_v2, %v719_v0 }
  0xfb   :  { %v144_v4 = vadd.f32 %v721_v3, %v677_v1 }
  0xfd   :  { %v679_v5 = vmul.f32 -1.442695, %v144_v4 }
  0xff   :  { %886 = vpow2.f32 %v679_v5 }
 0x109   :  { %v887_v6 = vpop.eup %886 }
 0x10a   :  { %v150_v7 = vadd.f32 1.0, %v887_v6  ;;  %v254_v6 = vld [vmem:[%s1268_s5 + $0x20] sm:$0xff] }
 0x10c   :  { %888 = vrcp.f32 %v150_v7  ;;  %v261_v7 = vld [vmem:[%s1268_s5 + $0x58] sm:$0xff] }
 0x10d   :  { %v856_v13 = vpack.c.bf16 %v261_v7, %v254_v6  ;;  %v334_v6 = vsub.s32 6, %v309_v41  ;;  %v330_v7 = vsub.s32 5, %v309_v41 }
 0x10f   :  { %v331_v10 = vrot.slane %v306_v44, %v330_v7 }
 0x116   :  { %v889_v8 = vpop.eup %888 }
 0x117   :  { %v153_v9 = vmul.f32 %v889_v8, %v144_v4  ;;  %v256_v8 = vld [vmem:[%s1268_s5 + $0x30] sm:$0xff] }
 0x119   :  { %757 = vmatmul.mubr.msk.f32.vlgmr.msra.gmra.mrb[0].mxu1 %vm169_vm1, %v153_v9  ;;  %v263_v9 = vld [vmem:[%s1268_s5 + $0x68] sm:$0xff] }
 0x11a   :  { %410 = vmatprep.mubr.f32.mxu1 %v896_v63  ;;  %825 = vmatpush1.bf16.msra.mxu1 %v824_v18  ;;  %v871_v14 = vpack.c.bf16 %v263_v9, %v256_v8  ;;  %v275_v18 = vld [vmem:[%s1268_s5 + $0xc8] sm:$0xff]  ;;  %v335_v9 = vrot.slane %v306_v44, %v334_v6 }
 0x11b   :  { %827 = vmatprep.subr.bf16.mxu1 %v826_v25  ;;  %v860_v23 = vpack.c.bf16 %v275_v18, %v268_v15  ;;  %v282_v25 = vld [vmem:[%s1268_s5 + $0x100] sm:$0xff] }
 0x11c   :  { %v864_v32 = vpack.c.bf16 %v289_v27, %v282_v25 }
 0x11e   :  { %829 = vmatpush1.bf16.msra.mxu1 %v828_v30  ;;  %v297_v30 = vld [vmem:[%s1268_s5 + $0x178] sm:$0xff] }
 0x11f   :  { %831 = vmatprep.subr.bf16.mxu1 %v830_v37  ;;  %v866_v35 = vpack.c.bf16 %v304_v31, %v297_v30  ;;  %v305_v37 = vld [vmem:[%s1268_s5 + $0x1b8] sm:$0xff] }
 0x122   :  { %833 = vmatpush1.bf16.msra.mxu1 %v832_v42  ;;  %v310_v42 = vsub.s32 0, %v309_v41 }
 0x123   :  { %835 = vmatprep.subr.bf16.mxu1 %v834_v49 }
 0x124   :  { %v311_v49 = vrot.slane %v306_v44, %v310_v42 }
 0x126   :  { %837 = vmatpush1.bf16.msra.mxu1 %v836_v55 }
 0x127   :  { %855 = vmatprep.subr.bf16.mxu1 %v854_v61  ;;  %v643_v61 = vsub.s32 %v640_v51, %v309_v41 }
 0x1ec   :  { %v239_v0 = vpop.f32.mrb[0].mxu1 }
 0x1ed   :  { %v240_v1 = vadd.f32 %v680_v62, %v239_v0  ;;  %v758_v2 = vpop.f32.mrb[1].mxu1 }
 0x1ef   :  { %v682_v3 = vmul.f32 -1.442695, %v240_v1 }
 0x1f1   :  { %890 = vpow2.f32 %v682_v3 }
 0x1fb   :  { %v891_v4 = vpop.eup %890 }
 0x1fc   :  { %v246_v5 = vadd.f32 1.0, %v891_v4 }
 0x1fe   :  { %892 = vrcp.f32 %v246_v5  ;;  %v326_v5 = vsub.s32 4, %v309_v41 }
 0x200   :  { %v327_v8 = vrot.slane %v306_v44, %v326_v5 }
 0x208   :  { %v893_v12 = vpop.eup %892 }
 0x209   :  { %v249_v16 = vmul.f32 %v893_v12, %v240_v1 }
 0x20b   :  { %683 = vmatmul.mubr.msk.f32.vlgmr.msra.gmra.mrb[2].mxu1 %vm169_vm1, %v249_v16  ;;  %684 = vmatmul.mubr.msk.f32.vlgmr.msra.gmra.mrb[2].mxu0 %vm169_vm1, %v249_v16 }
 0x20c   :  { %857 = vmatpush1.bf16.msra.mxu1 %v856_v13  ;;  %872 = vmatpush3.bf16.msra.mxu0 %v871_v14 }
 0x20d   :  { %859 = vmatprep.subr.bf16.mxu1 %v858_v17  ;;  %873 = vmatprep.subr.bf16.mxu0 %v894_v53 }
 0x20e   :  { %552 = vmatprep.mubr.f32.mxu1 %v896_v63  ;;  %775 = vmatprep.mubr.msk.f32.mxu0 %vm895_vm0, %v896_v63  ;;  %v298_v63 = vld [vmem:[%s1268_s5 + $0x180] sm:$0xff] }
 0x20f   :  { %v880_v39 = vpack.c.bf16 %v305_v37, %v298_v63 }
 0x210   :  { %861 = vmatpush1.bf16.msra.mxu1 %v860_v23  ;;  %875 = vmatpush3.bf16.msra.mxu0 %v874_v24 }
 0x211   :  { %863 = vmatprep.subr.bf16.mxu1 %v862_v26  ;;  %876 = vmatprep.subr.bf16.mxu0 %v894_v53 }
 0x214   :  { %865 = vmatpush1.bf16.msra.mxu1 %v864_v32  ;;  %878 = vmatpush3.bf16.msra.mxu0 %v877_v33 }
 0x215   :  { %867 = vmatprep.subr.bf16.mxu1 %v866_v35  ;;  %879 = vmatprep.subr.bf16.mxu0 %v894_v53  ;;  %v319_v53 = vrot.slane %v306_v44, %v318_v43 }
 0x218   :  { %869 = vmatpush1.bf16.msra.mxu1 %v868_v38  ;;  %881 = vmatpush3.bf16.msra.mxu0 %v880_v39 }
 0x21b   :  { %685 = vmatmul.mubr.msk.f32.vlgmr.msra.gmra.mrb[4].mxu1 %vm169_vm1, %v249_v16  ;;  %776 = vmatmul.mubr.msk.f32.vlgmr.msra.gmra.mrb[4].mxu0 %vm169_vm1, %v249_v16 }
 0x2de   :  { %v412_v54 = vpop.f32.mrb[2].mxu1  ;;  %v483_v55 = vpop.f32.mrb[2].mxu0 }
 0x2df   :  { %v413_v56 = vadd.f32 %v412_v54, %v311_v49  ;;  %v484_v57 = vadd.f32 %v483_v55, %v319_v53  ;;  %v414_v58 = vpop.f32.mrb[3].mxu1  ;;  %v485_v59 = vpop.f32.mrb[3].mxu0 }
 0x2e0   :  { %v415_v60 = vadd.f32 %v414_v58, %v315_v50  ;;  %v486_v62 = vadd.f32 %v485_v59, %v323_v52 }
 0x2e2   :  { %v636_v0 = vcombine.low %v413_v56, %v415_v60  ;;  %v637_v1 = vcombine.low %v484_v57, %v486_v62 }
 0x2e4   :  { %v644_v2 = vrot.slane %v636_v0, %v643_v61  ;;  %v651_v3 = vrot.slane %v637_v1, %v643_v61 }
 0x2e6   :  { %v652_v4 = vcombine.low %v644_v2, %v651_v3 }
 0x2e8   :  { %671 = vst [vmem:[%s1271_s7] sm:$0xff] %v652_v4 }
 0x2ee   :  { %v554_v11 = vpop.f32.mrb[4].mxu1  ;;  %v625_v12 = vpop.f32.mrb[4].mxu0 }
 0x2ef   :  { %v555_v13 = vadd.f32 %v554_v11, %v327_v8  ;;  %v556_v14 = vpop.f32.mrb[5].mxu1  ;;  %v777_v15 = vpop.f32.mrb[5].mxu0  ;;  %v626_v16 = vadd.f32 %v625_v12, %v335_v9 }
 0x2f0   :  { %v557_v17 = vadd.f32 %v556_v14, %v331_v10 }
 0x2f1   :  { %v667_v19 = vrot.slane %v626_v16, %v643_v61 }
 0x2f2   :  { %v653_v18 = vcombine.low %v555_v13, %v557_v17 }
 0x2f4   :  { %v660_v20 = vrot.slane %v653_v18, %v643_v61 }
 0x2f6   :  { %v668_v21 = vcombine.low %v660_v20, %v667_v19 }
 0x2f8   :  { %672 = vst [vmem:[%s1271_s7 + $0x8] sm:$0x3f] %v668_v21 }

// kernel: dit_forward_pallas.3
= control target key start
LH: loop header
LB: loop body
LE: loop exit
PB: predicated region body
PF: predicated region fallthrough
CT: control target
= control target key end

     0   :  { %s2659_s21 = smov 0   ;;  %s2661_s22 = smov 0   ;;  %s3011_s0 = inlined_call_operand.vmem [shape: bf16[2,16,128], index: 0, kind: input, shape index: {}]   ;;  %s3012_s1 = inlined_call_operand.vmem [shape: bf16[128,64], index: 1, kind: input, shape index: {}]   ;;  %s3013_s2 = inlined_call_operand.vmem [shape: f32[16,64], index: 2, kind: input, shape index: {}]   ;;  %s3014_s3 = inlined_call_operand.vmem [shape: f32[2,2,6,64], index: 3, kind: input, shape index: {}]   ;;  %s3015_s4 = inlined_call_operand.vmem [shape: f32[2,2,64], index: 4, kind: input, shape index: {}]   ;;  %s3016_s5 = inlined_call_operand.vmem [shape: bf16[2,64,192], index: 5, kind: input, shape index: {}]   ;;  %s3017_s6 = inlined_call_operand.vmem [shape: bf16[2,64,64], index: 6, kind: input, shape index: {}]   ;;  %s3018_s7 = inlined_call_operand.vmem [shape: bf16[2,64,256], index: 7, kind: input, shape index: {}]   ;;  %s3019_s8 = inlined_call_operand.vmem [shape: bf16[2,256,64], index: 8, kind: input, shape index: {}]   ;;  %s3020_s9 = inlined_call_operand.vmem [shape: f32[2,1,768], index: 9, kind: input, shape index: {}]   ;;  %s3021_s10 = inlined_call_operand.vmem [shape: bf16[64,128], index: 10, kind: input, shape index: {}]   ;;  %s3022_s11 = inlined_call_operand.vmem [shape: f32[1,128], index: 11, kind: input, shape index: {}]   ;;  %s3023_s12 = inlined_call_operand.vmem [shape: f32[32,128], index: 12, kind: output, shape index: {}]  }
   0x1   :  { %3028 = sst [smem:[#allocation8_spill]] %s3011_s0  ;;  %s2663_s23 = smov 0  }
   0x2   :  { %3029 = sst [smem:[#allocation9_spill]] %s3014_s3  ;;  %s2665_s24 = smov 0  }
   0x3   :  { %3030 = sst [smem:[#allocation10_spill]] %s3015_s4  ;;  %s2667_s25 = smov 0  }
   0x4   :  { %3031 = sst [smem:[#allocation11_spill]] %s3021_s10 }
   0x5   :  { %3032 = sst [smem:[#allocation12_spill]] %s3022_s11 }
   0x6 LB: > { %3033 = sst [smem:[#allocation3_spill]] %s2570_s23  ;;  %s31_s26 = sadd.s32 1, %s2570_s23  ;;  %s2578_s25 = sphi %s2667_s25, %s22_s25   ;;  %s2574_s24 = sphi %s2665_s24, %s3048_s24   ;;  %s2570_s23 = sphi %s2663_s23, %s3047_s23   ;;  %s2566_s22 = sphi %s2661_s22, %s3046_s22   ;;  %s2562_s21 = sphi %s2659_s21, %s3045_s21  }
   0x7   : > { %3034 = sst [smem:[#allocation4_spill]] %s2574_s24  ;;  %s34_s27 = sadd.s32 1, %s2574_s24 }
   0x8   : > { %3035 = sst [smem:[#allocation5_spill]] %s2578_s25  ;;  %p32_p0 = scmp.ge.s32.totalorder %s31_s26, 2 }
   0x9   : > { %p2122_p1 = scmp.ge.s32.totalorder %s2578_s25, 1  ;;  %p447_p2 = scmp.lt.s32.totalorder %s2578_s25, 5 }
   0xa   : > { %s3050_s26 = smov (%p32_p0, %s31_s26), 0  ;;  %s3052_s27 = smov (!%p32_p0, %s34_s27), %s2574_s24 }
   0xb   : > { %3036 = sst [smem:[#allocation6_spill]] %s3050_s26  ;;  %p448_p3 = pnand %p2122_p1, %p447_p2 }
   0xc   : > { %p36_p4 = scmp.ge.s32.totalorder %s3052_s27, 2  ;;  %p525_p5 = scmp.lt.s32.totalorder (!%p448_p3), %s2566_s22, 1 }
   0xd   : > { %451 = sbr.rel (%p448_p3) target bundleno = 3409 (0xd51), region = 68  ;;  %p532_p6 = scmp.lt.s32.totalorder (!%p448_p3), %s2562_s21, 1 }
   0xe   : > { %s3054_s27 = smov (%p36_p4, %s3052_s27), 0  ;;  %s2136_s28 = sshll.u32 (!%p448_p3), %s2566_s22, 1 }
   0xf   : > { %3037 = sst [smem:[#allocation7_spill]] %s3054_s27  ;;  %s3038_s0 = sld [smem:[#allocation8_spill]] (!%p448_p3) }
  0x10   : > { %s3039_s4 = sld [smem:[#allocation10_spill]] (!%p448_p3)  ;;  %s3040_s3 = sld [smem:[#allocation9_spill]] (!%p448_p3) }
  0x11   : > { %p567_p7 = scmp.lt.s32.totalorder (!%p448_p3), %s2136_s28, 3  ;;  %p2138_p8 = scmp.ne.s32.totalorder (!%p448_p3), %s2562_s21, 0 }
  0x14   : > { %s3056_s22 = smov (!%p525_p5, %s2566_s22), 1  ;;  %s3058_s28 = smov (!%p567_p7, %s2136_s28), 3 }
  0x15   : > { %s533_s29 = scalar_select %p532_p6, %s2562_s21, 1 }
  0x16   : > { %s2207_s30 = sshll.u32 %s3056_s22, 3  ;;  %s2125_s13 = sshll.u32 %s3056_s22, 1  ;;  %v2416_v0 = vld [vmem:[%s3012_s1] sm:$0xff] (!%p2138_p8)   ;;  %v2580_v1 = vmov (!%p2138_p8), 0.0   ;;  %v2417_v2 = vld [vmem:[%s3012_s1 + $0x8] sm:$0xff] (!%p2138_p8)   ;;  %vm2581_vm0 = vmmov (!%p2138_p8), 0  }
  0x17   : > { %s2701_s16 = scalar_lea.vmem %s3038_s0, %s2207_s30  ;;  %s535_s17 = sadd.s32 %s2125_s13, %s533_s29  ;;  %2269 = vmatprep.subr.bf16.mxu0 (!%p2138_p8), %v2580_v1  ;;  %2285 = vmatprep.mubr.msk.bf16.mxu0 (!%p2138_p8), %vm2581_vm0, %v2580_v1  ;;  %v2418_v3 = vld [vmem:[%s3012_s1 + $0x10] sm:$0xff] (!%p2138_p8)   ;;  %v2419_v4 = vld [vmem:[%s3012_s1 + $0x18] sm:$0xff] (!%p2138_p8)   ;;  %v2420_v5 = vld [vmem:[%s3012_s1 + $0x20] sm:$0xff] (!%p2138_p8)   ;;  %vm694_vm1 = vcmask (!%p2138_p8), 523264  }
  0x18   : > { %s2126_s18 = sshll.u32 %s535_s17, 3  ;;  %s2706_s27 = scalar_lea.vmem %s3039_s4, %s2125_s13  ;;  %2270 = vmatpush3.bf16.msra.mxu0 (!%p2138_p8), %v2416_v0  ;;  %v2421_v6 = vld [vmem:[%s3012_s1 + $0x28] sm:$0xff] (!%p2138_p8)   ;;  %v2422_v7 = vld [vmem:[%s3012_s1 + $0x30] sm:$0xff] (!%p2138_p8)   ;;  %v2423_v8 = vld [vmem:[%s3012_s1 + $0x38] sm:$0xff] (!%p2138_p8)  }
  0x19   : > { %s2711_s23 = scalar_lea.vmem %s3040_s3, %s2126_s18  ;;  %s2208_s25 = sshll.u32 %s533_s29, 6  ;;  %2271 = vmatprep.subr.bf16.mxu0 (!%p2138_p8), %v2580_v1  ;;  %v2424_v9 = vld [vmem:[%s2701_s16] sm:$0xff] (!%p2138_p8)   ;;  %v691_v12 = vld [vmem:[%s3013_s2 + $0x8] sm:$0xff] (!%p2138_p8) }
  0x1a   : > { %s2716_s10 = scalar_lea.vmem %s3016_s5, %s2208_s25  ;;  %s2209_s30 = sshll.u32 %s533_s29, 5  ;;  %v690_v10 = vld [vmem:[%s3013_s2] sm:$0xff] (!%p2138_p8) }
  0x1b   : > { %s2721_s17 = scalar_lea.vmem %s3017_s6, %s2209_s30  ;;  %s2726_s20 = scalar_lea.vmem %s3018_s7, %s2208_s25 }
  0x1c   : > { %s2211_s24 = sshll.u32 %s533_s29, 7  ;;  %s2361_s26 = smul.u32 6, %s533_s29  ;;  %2272 = vmatpush3.bf16.msra.mxu0 (!%p2138_p8), %v2417_v2 }
  0x1d   : > { %s2731_s3 = scalar_lea.vmem %s3019_s8, %s2211_s24  ;;  %s2137_s30 = sshll.u32 %s3058_s28, 3  ;;  %2273 = vmatprep.subr.bf16.mxu0 (!%p2138_p8), %v2580_v1 }
  0x1e   : > { %s2736_s4 = scalar_lea.vmem %s3020_s9, %s2361_s26  ;;  %s2741_s25 = scalar_lea.vmem %s3023_s12, %s2137_s30 }
  0x1f   : > { %576 = sbr.rel (%p2138_p8) target bundleno = 272 (0x110), region = 72 }
  0x20   : > { %2274 = vmatpush3.bf16.msra.mxu0 (!%p2138_p8), %v2418_v3 }
  0x21   : > { %2275 = vmatprep.subr.bf16.mxu0 (!%p2138_p8), %v2580_v1 }
  0x24   : > { %2276 = vmatpush3.bf16.msra.mxu0 (!%p2138_p8), %v2419_v4 }
  0x25   : > { %2277 = vmatprep.subr.bf16.mxu0 (!%p2138_p8), %v2580_v1 }
  0x28   : > { %2278 = vmatpush3.bf16.msra.mxu0 %v2420_v5 }
  0x29   : > { %2279 = vmatprep.subr.bf16.mxu0 %v2580_v1 }
  0x2c   : > { %2280 = vmatpush3.bf16.msra.mxu0 %v2421_v6 }
  0x2d   : > { %2281 = vmatprep.subr.bf16.mxu0 %v2580_v1 }
  0x30   : > { %2282 = vmatpush3.bf16.msra.mxu0 %v2422_v7 }
  0x31   : > { %2283 = vmatprep.subr.bf16.mxu0 %v2580_v1 }
  0x34   : > { %2284 = vmatpush3.bf16.msra.mxu0 %v2423_v8 }
  0x37   : > { %2286 = vmatmul.mubr.bf16.vlgmr.msra.gmra.mrb[0].mxu0 %v2424_v9 }
 0x10a   : > { %v683_v11 = vpop.f32.mrb[0].mxu0 }
 0x10b   : > { %v692_v13 = vadd.f32 %v690_v10, %v683_v11  ;;  %v2287_v14 = vpop.f32.mrb[1].mxu0 }
 0x10c   : > { %v686_v15 = vpop.f32.mrb[2].mxu0 }
 0x10d   : > { %695 = vst.msk [vmem:[#allocation2] sm:$0xff] %vm694_vm1, %v692_v13  ;;  %v693_v16 = vadd.f32 %v691_v12, %v686_v15  ;;  %v2288_v17 = vpop.f32.mrb[3].mxu0 }
 0x10f   : > { %696 = vst.msk [vmem:[#allocation2 + $0x8] sm:$0xff] %vm694_vm1, %v693_v16 }
 0x110 PF: > { %vm700_vm2 = vcmask 523264   ;;  %v2440_v32 = vld [vmem:[%s2716_s10 + $0x4] ss:$8 sps:$4 sm:$0xff]   ;;  %v2442_v33 = vld [vmem:[%s2716_s10] ss:$8 sps:$4 sm:$0xff]   ;;  %v2582_v40 = vmov 0   ;;  %v729_v45 = vlaneseq }
 0x111   : > { %805 = vmatprep.subr.bf16.mxu1 %v2440_v32  ;;  %v2443_v34 = vld [vmem:[%s2716_s10 + $0x14] ss:$8 sps:$4 sm:$0xff]   ;;  %v2445_v35 = vld [vmem:[%s2716_s10 + $0x10] ss:$8 sps:$4 sm:$0xff]   ;;  %v2446_v36 = vld [vmem:[%s2716_s10 + $0x24] ss:$8 sps:$4 sm:$0xff]   ;;  %837 = vmatprep.mubr.bf16.mxu1 %v2582_v40 }
 0x112   : > { %806 = vmatpush1.bf16.msra.mxu1 %v2442_v33  ;;  %v2448_v37 = vld [vmem:[%s2716_s10 + $0x20] ss:$8 sps:$4 sm:$0xff]   ;;  %v2449_v38 = vld [vmem:[%s2716_s10 + $0x34] ss:$8 sps:$4 sm:$0xff]   ;;  %v2451_v39 = vld [vmem:[%s2716_s10 + $0x30] ss:$8 sps:$4 sm:$0xff]  }
 0x113   : > { %807 = vmatprep.subr.bf16.mxu1 %v2443_v34  ;;  %v2796_v48 = vshrl.u32 %v729_v45, 7  ;;  %v2799_v49 = vld [vmem:[%s2711_s23] sm:$0x3f]  ;;  %v2583_v1 = vmov 0.0   ;;  %vm2584_vm3 = vmmov 0   ;;  %s2585_s10 = smov 48  }
 0x114   : > { %v2775_v18 = vld [vmem:[#allocation2] sm:$0xff]  ;;  %v2802_v50 = vadd.f32 1.0, %v2799_v49  ;;  %2301 = vmatprep.subr.bf16.mxu0 %v2583_v1  ;;  %2303 = vmatprep.mubr.msk.bf16.mxu0 %vm2584_vm3, %v2583_v1  ;;  %s2586_s23 = smov 64   ;;  %s2587_s16 = smov 96   ;;  %vm856_vm4 = vcmask 130048   ;;  %vm1362_vm5 = vcmask 261120  }
 0x115   : > { %v701_v20 = vsel %vm700_vm2, %v2775_v18, 0.0  ;;  %v2805_v51 = vsub.s32 1, %v2796_v48  ;;  %v2810_v55 = vsub.s32 0, %v2796_v48  ;;  %v750_v0 = vld [vmem:[%s2736_s4] sm:$0x3]  ;;  %s2588_s18 = smov 112  }
 0x116   : > { %v2777_v19 = vld [vmem:[#allocation2 + $0x8] sm:$0xff]  ;;  %702 = vadd.xlane.f32.xlu0 %v701_v20  ;;  %808 = vmatpush1.bf16.msra.mxu1 %v2445_v35  ;;  %s2589_s11 = smov 80   ;;  %s2590_s22 = smov 32   ;;  %vm1365_vm6 = vcmask 392192  }
 0x117   : > { %v704_v21 = vsel %vm700_vm2, %v2777_v19, 0.0  ;;  %809 = vmatprep.subr.bf16.mxu1 %v2446_v36  ;;  %v732_v54 = vrot.slane %v2802_v50, %v2805_v51  ;;  %v738_v59 = vrot.slane %v2799_v49, %v2810_v55  ;;  %v755_v2 = vrot.slane %v750_v0, %v2810_v55  ;;  %s2591_s30 = smov 16   ;;  %p2197_p9 = scmp.ne.s32.totalorder %s2562_s21, 1 }
 0x118   : > { %v759_v4 = vrot.slane %v750_v0, %v2805_v51  ;;  %s3041_s21 = sld [smem:[#allocation11_spill]] (!%p2197_p9)  ;;  %vm2593_vm7 = vmmov (!%p2197_p9), 0   ;;  %s3043_s24 = sld [smem:[#allocation12_spill]] (!%p2197_p9) }
 0x11a   : > { %705 = vadd.xlane.f32.xlu0 %v704_v21  ;;  %810 = vmatpush1.bf16.msra.mxu1 %v2448_v37 }
 0x11b   : > { %811 = vmatprep.subr.bf16.mxu1 %v2449_v38 }
 0x11e   : > { %812 = vmatpush1.bf16.msra.mxu1 %v2451_v39 }
 0x11f   : > { %2289 = vmatprep.subr.bf16.mxu1 %v2583_v1 }
 0x1a3   : > { %v703_v22 = vpop.xlane.xlu0 %702 }
 0x1a4   : > { %v708_v23 = vmul.f32 0.015625, %v703_v22 }
 0x1a6   : > { %v710_v24 = vsub.f32 %v2775_v18, %v708_v23 }
 0x1a7   : > { %v706_v25 = vpop.xlane.xlu0 %705 }
 0x1a8   : > { %v709_v26 = vmul.f32 0.015625, %v706_v25  ;;  %v712_v27 = vmul.f32 %v710_v24, %v710_v24 }
 0x1aa   : > { %v711_v28 = vsub.f32 %v2777_v19, %v709_v26  ;;  %v714_v29 = vsel %vm700_vm2, %v712_v27, 0.0 }
 0x1ab   : > { %715 = vadd.xlane.f32.xlu1 %v714_v29 }
 0x1ac   : > { %v713_v30 = vmul.f32 %v711_v28, %v711_v28 }
 0x1ae   : > { %v717_v31 = vsel %vm700_vm2, %v713_v30, 0.0 }
 0x1af   : > { %718 = vadd.xlane.f32.xlu1 %v717_v31 }
 0x238   : > { %v716_v41 = vpop.xlane.xlu1 %715 }
 0x239   : > { %v720_v42 = vmul.f32 0.015625, %v716_v41 }
 0x23b   : > { %v722_v43 = vadd.f32 1e-06, %v720_v42 }
 0x23c   : > { %v719_v44 = vpop.xlane.xlu1 %718 }
 0x23d   : > { %2484 = vrsqrt.f32 %v722_v43  ;;  %v721_v46 = vmul.f32 0.015625, %v719_v44 }
 0x23f   : > { %v723_v47 = vadd.f32 1e-06, %v721_v46 }
 0x241   : > { %2486 = vrsqrt.f32 %v723_v47 }
 0x247   : > { %v2485_v52 = vpop.eup %2484 }
 0x248   : > { %v726_v53 = vmul.f32 %v2485_v52, %v710_v24 }
 0x24a   : > { %v733_v58 = vmul.f32 %v732_v54, %v726_v53 }
 0x24b   : > { %v2487_v56 = vpop.eup %2486 }
 0x24c   : > { %v727_v57 = vmul.f32 %v2487_v56, %v711_v28  ;;  %v739_v61 = vadd.f32 %v738_v59, %v733_v58 }
 0x24e   : > { %v734_v60 = vmul.f32 %v732_v54, %v727_v57 }
 0x250   : > { %v740_v62 = vadd.f32 %v738_v59, %v734_v60 }
 0x252   : > { %v741_v63 = vpack.c.bf16 %v740_v62, %v739_v61 }
 0x254   : > { %2156 = vmatmul.mubr.msk.bf16.vlgmr.msra.gmra.mrb[0].mxu1 %vm700_vm2, %v741_v63 }
 0x255   : > { %2291 = vmatprep.mubr.msk.bf16.mxu1 %vm2584_vm3, %v2583_v1 }
 0x327   : > { %v839_v3 = vpop.f32.mrb[0].mxu1 }
 0x328   : > { %v840_v5 = vadd.f32 %v839_v3, %v755_v2  ;;  %v841_v6 = vpop.f32.mrb[1].mxu1 }
 0x329   : > { %v843_v7 = vpop.f32.mrb[2].mxu1  ;;  %v842_v10 = vadd.f32 %v841_v6, %v759_v4 }
 0x32a   : > { %v844_v8 = vadd.f32 %v843_v7, %v755_v2  ;;  %v845_v9 = vpop.f32.mrb[3].mxu1  ;;  %v848_v12 = vmul.f32 0.25, %v840_v5 }
 0x32b   : > { %v846_v11 = vadd.f32 %v845_v9, %v759_v4 }
 0x32c   : > { %v849_v13 = vmul.f32 0.25, %v844_v8  ;;  %v851_v14 = vpack.c.bf16 %v844_v8, %v840_v5 }
 0x32d   : > { %v2824_v15 = vpack.c.bf16 %v846_v11, %v842_v10 }
 0x32e   : > { %v850_v16 = vpack.c.bf16 %v849_v13, %v848_v12  ;;  %974 = vrot.lane.b32.xlu1 %v851_v14, %s2585_s10  ;;  %854 = vrot.lane.b32.xlu0 %v851_v14, %s2586_s23 }
 0x332   : > { %1094 = vrot.lane.b32.xlu0 %v850_v16, %s2587_s16  ;;  %972 = vrot.lane.b32.xlu1 %v850_v16, %s2588_s18 }
 0x336   : > { %1215 = vrot.lane.b32.xlu0 %v850_v16, %s2589_s11  ;;  %1096 = vrot.lane.b32.xlu1 %v851_v14, %s2590_s22 }
 0x33a   : > { %1217 = vrot.lane.b32.xlu1 %v851_v14, %s2591_s30 }
 0x3a0   : > { %v975_v17 = vpop.permute.xlu1 %974  ;;  %v855_v20 = vpop.permute.xlu0 %854 }
 0x3a1   : > { %v861_v21 = vsel %vm856_vm4, %v855_v20, 0  ;;  %v980_v22 = vsel %vm856_vm4, %v975_v17, 0 }
 0x3a2   : > { %2290 = vmatpush3.bf16.xpose.msra.mxu1 %v861_v21  ;;  %2302 = vmatpush3.bf16.xpose.msra.mxu0 %v980_v22 }
 0x3a3   : > { %2295 = vmatprep.subr.bf16.mxu1 %v2583_v1  ;;  %2313 = vmatprep.subr.bf16.mxu0 %v2583_v1 }
 0x3a4   : > { %v973_v23 = vpop.permute.xlu1 %972  ;;  %v1095_v27 = vpop.permute.xlu0 %1094 }
 0x3a8   : > { %v1097_v24 = vpop.permute.xlu1 %1096  ;;  %v1216_v29 = vpop.permute.xlu0 %1215 }
 0x3a9   : > { %v1102_v25 = vsel %vm856_vm4, %v1097_v24, 0  ;;  %2292 = vmatmul.mubr.msk.bf16.vlgmr.msra.gmra.mrb[4].mxu1 %vm856_vm4, %v850_v16  ;;  %2304 = vmatmul.mubr.msk.bf16.vlgmr.msra.gmra.mrb[0].mxu0 %vm856_vm4, %v973_v23 }
 0x3aa   : > { %2296 = vmatpush3.bf16.msra.mxu1 %v2824_v15  ;;  %2314 = vmatpush3.bf16.xpose.msra.mxu0 %v1102_v25 }
 0x3ab   : > { %2315 = vmatprep.mubr.msk.bf16.mxu0 %vm2584_vm3, %v2583_v1  ;;  %2325 = vmatprep.subr.bf16.mxu0 %v2583_v1 }
 0x3ac   : > { %2297 = vmatprep.mubr.msk.bf16.mxu1 %vm2584_vm3, %v2583_v1  ;;  %2307 = vmatprep.subr.bf16.mxu1 %v2583_v1  ;;  %v1218_v26 = vpop.permute.xlu1 %1217 }
 0x3ad   : > { %v1223_v28 = vsel %vm856_vm4, %v1218_v26, 0 }
 0x3b1   : > { %2316 = vmatmul.mubr.msk.bf16.vlgmr.msra.gmra.mrb[4].mxu0 %vm856_vm4, %v1095_v27 }
 0x3b2   : > { %2326 = vmatpush3.bf16.xpose.msra.mxu0 %v1223_v28  ;;  %2327 = vmatprep.mubr.msk.bf16.mxu0 %vm2584_vm3, %v2583_v1 }
 0x3b3   : > { %2337 = vmatprep.subr.bf16.mxu0 %v2583_v1 }
 0x3b9   : > { %2328 = vmatmul.mubr.msk.bf16.vlgmr.msra.gmra.mrb[8].mxu0 %vm856_vm4, %v1216_v29 }
 0x3ba   : > { %2345 = vmatprep.mubr.msk.bf16.mxu0 %vm2584_vm3, %v2583_v1 }
 0x47c   : > { %v897_v30 = vpop.f32.mrb[4].mxu1  ;;  %v2854_v31 = vpop.f32.mrb[0].mxu0 }
 0x47d   : > { %v2293_v32 = vpop.f32.mrb[5].mxu1  ;;  %v2305_v33 = vpop.f32.mrb[1].mxu0  ;;  %v904_v34 = vsel %vm856_vm4, %v897_v30, -inf  ;;  %v1023_v41 = vsel %vm856_vm4, %v2854_v31, -inf }
 0x47e   : > { %v1019_v35 = vpop.f32.mrb[2].mxu0  ;;  %905 = vmax.xlane.f32.xlu1 %v904_v34  ;;  %v900_v36 = vpop.f32.mrb[6].mxu1 }
 0x47f   : > { %v2294_v37 = vpop.f32.mrb[7].mxu1  ;;  %v2306_v38 = vpop.f32.mrb[3].mxu0  ;;  %v907_v39 = vsel %vm856_vm4, %v900_v36, -inf  ;;  %v1026_v47 = vsel %vm856_vm4, %v1019_v35, -inf }
 0x480   : > { %908 = vmax.xlane.f32.xlu0 %v907_v39 }
 0x484   : > { %v1138_v42 = vpop.f32.mrb[4].mxu0  ;;  %1024 = vmax.xlane.f32.xlu0 %v1023_v41 }
 0x485   : > { %v2317_v43 = vpop.f32.mrb[5].mxu0  ;;  %v1145_v44 = vsel %vm856_vm4, %v1138_v42, -inf }
 0x486   : > { %v1141_v45 = vpop.f32.mrb[6].mxu0  ;;  %1146 = vmax.xlane.f32.xlu1 %v1145_v44 }
 0x487   : > { %v2318_v46 = vpop.f32.mrb[7].mxu0  ;;  %v1148_v52 = vsel %vm856_vm4, %v1141_v45, -inf }
 0x488   : > { %1027 = vmax.xlane.f32.xlu0 %v1026_v47 }
 0x48c   : > { %v1259_v53 = vpop.f32.mrb[8].mxu0  ;;  %1149 = vmax.xlane.f32.xlu0 %v1148_v52 }
 0x48d   : > { %v2329_v54 = vpop.f32.mrb[9].mxu0  ;;  %v1266_v56 = vsel %vm856_vm4, %v1259_v53, -inf }
 0x48e   : > { %v1262_v57 = vpop.f32.mrb[10].mxu0  ;;  %1267 = vmax.xlane.f32.xlu1 %v1266_v56 }
 0x48f   : > { %v2330_v58 = vpop.f32.mrb[11].mxu0  ;;  %v1269_v59 = vsel %vm856_vm4, %v1262_v57, -inf }
 0x490   : > { %1270 = vmax.xlane.f32.xlu0 %v1269_v59 }
 0x50b   : > { %v906_v60 = vpop.xlane.xlu1 %905 }
 0x50c   : > { %v910_v61 = vsub.f32 %v897_v30, %v906_v60 }
 0x50d   : > { %v909_v62 = vpop.xlane.xlu0 %908 }
 0x50e   : > { %v912_v63 = vmul.f32 1.442695, %v910_v61  ;;  %v911_v0 = vsub.f32 %v900_v36, %v909_v62 }
 0x510   : > { %2488 = vpow2.f32 %v912_v63  ;;  %v914_v2 = vmul.f32 1.442695, %v911_v0 }
 0x511   : > { %v1025_v3 = vpop.xlane.xlu0 %1024 }
 0x512   : > { %2490 = vpow2.f32 %v914_v2  ;;  %v1029_v26 = vsub.f32 %v2854_v31, %v1025_v3 }
 0x513   : > { %v1147_v27 = vpop.xlane.xlu1 %1146 }
 0x514   : > { %v1031_v28 = vmul.f32 1.442695, %v1029_v26  ;;  %v1151_v29 = vsub.f32 %v1138_v42, %v1147_v27  ;;  %v2454_v27 = vld [vmem:[%s2721_s17 + $0x10] sm:$0xff]  }
 0x515   : > { %v1028_v4 = vpop.xlane.xlu0 %1027 }
 0x516   : > { %v1030_v5 = vsub.f32 %v1019_v35, %v1028_v4  ;;  %v1153_v32 = vmul.f32 1.442695, %v1151_v29  ;;  %v2455_v29 = vld [vmem:[%s2721_s17 + $0x18] sm:$0xff]  }
 0x518   : > { %v1033_v6 = vmul.f32 1.442695, %v1030_v5 }
 0x519   : > { %v1150_v7 = vpop.xlane.xlu0 %1149 }
 0x51a   : > { %v2489_v8 = vpop.eup %2488  ;;  %2492 = vpow2.f32 %v1033_v6  ;;  %v1152_v9 = vsub.f32 %v1141_v45, %v1150_v7 }
 0x51b   : > { %v916_v10 = vsel %vm856_vm4, %v2489_v8, 0.0  ;;  %v1268_v30 = vpop.xlane.xlu1 %1267 }
 0x51c   : > { %v2491_v11 = vpop.eup %2490  ;;  %v1155_v12 = vmul.f32 1.442695, %v1152_v9  ;;  %917 = vadd.xlane.f32.xlu1 %v916_v10  ;;  %v1272_v33 = vsub.f32 %v1259_v53, %v1268_v30 }
 0x51d   : > { %v1271_v13 = vpop.xlane.xlu0 %1270  ;;  %v919_v14 = vsel %vm856_vm4, %v2491_v11, 0.0 }
 0x51e   : > { %2494 = vpow2.f32 %v1155_v12  ;;  %v1273_v16 = vsub.f32 %v1262_v57, %v1271_v13  ;;  %920 = vadd.xlane.f32.xlu0 %v919_v14  ;;  %v1274_v34 = vmul.f32 1.442695, %v1272_v33 }
 0x520   : > { %v1276_v17 = vmul.f32 1.442695, %v1273_v16 }
 0x522   : > { %2496 = vpow2.f32 %v1276_v17 }
 0x523   : > { %2498 = vpow2.f32 %v1031_v28 }
 0x524   : > { %v2493_v20 = vpop.eup %2492  ;;  %2500 = vpow2.f32 %v1153_v32 }
 0x525   : > { %v1038_v21 = vsel %vm856_vm4, %v2493_v20, 0.0  ;;  %2502 = vpow2.f32 %v1274_v34 }
 0x526   : > { %1039 = vadd.xlane.f32.xlu0 %v1038_v21 }
 0x528   : > { %v2868_v22 = vpop.eup %2494 }
 0x529   : > { %v1160_v23 = vsel %vm856_vm4, %v2868_v22, 0.0 }
 0x52a   : > { %1161 = vadd.xlane.f32.xlu0 %v1160_v23  ;;  %v2453_v23 = vld [vmem:[%s2721_s17 + $0x8] sm:$0xff]  }
 0x52c   : > { %v2872_v24 = vpop.eup %2496 }
 0x52d   : > { %1047 = vrot.lane.b32.xlu1 %v2824_v15, %s2588_s18  ;;  %v1281_v25 = vsel %vm856_vm4, %v2872_v24, 0.0  ;;  %v2499_v35 = vpop.eup %2498 }
 0x52e   : > { %1282 = vadd.xlane.f32.xlu0 %v1281_v25  ;;  %v1035_v36 = vsel %vm856_vm4, %v2499_v35, 0.0  ;;  %v2501_v37 = vpop.eup %2500 }
 0x52f   : > { %v1157_v31 = vsel %vm856_vm4, %v2501_v37, 0.0  ;;  %v2503_v38 = vpop.eup %2502 }
 0x530   : > { %v1278_v39 = vsel %vm856_vm4, %v2503_v38, 0.0 }
 0x544   : > { %1168 = vrot.lane.b32.xlu0 %v2824_v15, %s2587_s16 }
 0x551   : > { %1036 = vadd.xlane.f32.xlu1 %v1035_v36 }
 0x555   : > { %1158 = vadd.xlane.f32.xlu1 %v1157_v31 }
 0x559   : > { %1279 = vadd.xlane.f32.xlu1 %v1278_v39 }
 0x56a   : > { %1289 = vrot.lane.b32.xlu1 %v2824_v15, %s2589_s11 }
 0x5a9   : > { %v918_v41 = vpop.xlane.xlu1 %917 }
 0x5aa   : > { %2504 = vrcp.f32 %v918_v41 }
 0x5ab   : > { %v921_v42 = vpop.xlane.xlu0 %920 }
 0x5ac   : > { %2506 = vrcp.f32 %v921_v42 }
 0x5ad   : > { %v1048_v52 = vpop.permute.xlu1 %1047 }
 0x5b3   : > { %v1040_v53 = vpop.xlane.xlu0 %1039 }
 0x5b4   : > { %v2505_v43 = vpop.eup %2504  ;;  %2508 = vrcp.f32 %v1040_v53 }
 0x5b5   : > { %v924_v45 = vmul.f32 %v2505_v43, %v2489_v8 }
 0x5b6   : > { %v2507_v44 = vpop.eup %2506 }
 0x5b7   : > { %v925_v46 = vmul.f32 %v2507_v44, %v2491_v11  ;;  %v1162_v54 = vpop.xlane.xlu0 %1161 }
 0x5b9   : > { %v926_v47 = vpack.c.bf16 %v925_v46, %v924_v45 }
 0x5bb   : > { %2298 = vmatmul.mubr.msk.bf16.vlgmr.msra.gmra.mrb[8].mxu1 %vm856_vm4, %v926_v47  ;;  %v1283_v58 = vpop.xlane.xlu0 %1282 }
 0x5bc   : > { %2308 = vmatpush3.bf16.msra.mxu1 %v1048_v52  ;;  %2309 = vmatprep.mubr.msk.bf16.mxu1 %vm2584_vm3, %v2583_v1 }
 0x5bd   : > { %2319 = vmatprep.subr.bf16.mxu1 %v2583_v1 }
 0x5be   : > { %v2509_v57 = vpop.eup %2508 }
 0x5bf   : > { %v1044_v61 = vmul.f32 %v2509_v57, %v2493_v20  ;;  %v1169_v2 = vpop.permute.xlu0 %1168  ;;  %v2452_v20 = vld [vmem:[%s2721_s17] sm:$0xff]   ;;  %s3042_s17 = smov (!%p2197_p9), %s3041_s21 }
 0x5c0   : > { %2338 = vmatpush3.bf16.msra.mxu0 %v2452_v20 }
 0x5c1   : > { %2339 = vmatprep.subr.bf16.mxu0 %v2583_v1 }
 0x5c4   : > { %2340 = vmatpush3.bf16.msra.mxu0 %v2453_v23  ;;  %v2461_v23 = vld [vmem:[%s2726_s20 + $0x14] ss:$8 sps:$4 sm:$0xff]  }
 0x5c5   : > { %2341 = vmatprep.subr.bf16.mxu0 %v2583_v1 }
 0x5c8   : > { %2342 = vmatpush3.bf16.msra.mxu0 %v2454_v27  ;;  %v2465_v27 = vld [vmem:[%s2726_s20 + $0x30] ss:$8 sps:$4 sm:$0xff]  }
 0x5c9   : > { %2343 = vmatprep.subr.bf16.mxu0 %v2583_v1 }
 0x5cc   : > { %2344 = vmatpush3.bf16.msra.mxu0 %v2455_v29 }
 0x5de   : > { %v1037_v15 = vpop.xlane.xlu1 %1036 }
 0x5df   : > { %2510 = vrcp.f32 %v1037_v15 }
 0x5e2   : > { %v1159_v56 = vpop.xlane.xlu1 %1158 }
 0x5e3   : > { %2512 = vrcp.f32 %v1159_v56 }
 0x5e4   : > { %2514 = vrcp.f32 %v1162_v54 }
 0x5e6   : > { %v1280_v59 = vpop.xlane.xlu1 %1279 }
 0x5e7   : > { %2516 = vrcp.f32 %v1280_v59  ;;  %v2165_v59 = vld [vmem:[%s2736_s4 + $0x2] ss:$0 sm:$0xff] }
 0x5e8   : > { %2518 = vrcp.f32 %v1283_v58  ;;  %v1454_v58 = vsub.s32 2, %v2796_v48 }
 0x5e9   : > { %v2511_v60 = vpop.eup %2510 }
 0x5ea   : > { %v1043_v62 = vmul.f32 %v2511_v60, %v2499_v35  ;;  %v1290_v8 = vpop.permute.xlu1 %1289  ;;  %v1455_v60 = vrot.slane %v2799_v49, %v1454_v58  ;;  %v2476_v58 = vld [vmem:[%s2731_s3 + $0x60] sm:$0xff]  }
 0x5ec   : > { %v1045_v63 = vpack.c.bf16 %v1044_v61, %v1043_v62 }
 0x5ed   : > { %v2513_v0 = vpop.eup %2512 }
 0x5ee   : > { %2310 = vmatmul.mubr.msk.bf16.vlgmr.msra.gmra.mrb[12].mxu1 %vm856_vm4, %v1045_v63  ;;  %v2515_v3 = vpop.eup %2514  ;;  %v1165_v4 = vmul.f32 %v2513_v0, %v2501_v37 }
 0x5ef   : > { %2320 = vmatpush3.bf16.msra.mxu1 %v1169_v2  ;;  %2321 = vmatprep.mubr.msk.bf16.mxu1 %vm2584_vm3, %v2583_v1  ;;  %v1166_v5 = vmul.f32 %v2515_v3, %v2868_v22 }
 0x5f0   : > { %2331 = vmatprep.subr.bf16.mxu1 %v2583_v1 }
 0x5f1   : > { %v1167_v6 = vpack.c.bf16 %v1166_v5, %v1165_v4  ;;  %v2517_v7 = vpop.eup %2516 }
 0x5f2   : > { %v2519_v9 = vpop.eup %2518  ;;  %v1286_v10 = vmul.f32 %v2517_v7, %v2503_v38 }
 0x5f3   : > { %v1287_v11 = vmul.f32 %v2519_v9, %v2872_v24 }
 0x5f5   : > { %v1288_v12 = vpack.c.bf16 %v1287_v11, %v1286_v10 }
 0x5f6   : > { %2322 = vmatmul.mubr.msk.bf16.vlgmr.msra.gmra.mrb[16].mxu1 %vm856_vm4, %v1167_v6 }
 0x5f7   : > { %2332 = vmatpush3.bf16.msra.mxu1 %v1290_v8  ;;  %2333 = vmatprep.mubr.msk.bf16.mxu1 %vm2584_vm3, %v2583_v1 }
 0x5fe   : > { %2334 = vmatmul.mubr.msk.bf16.vlgmr.msra.gmra.mrb[20].mxu1 %vm856_vm4, %v1288_v12 }
 0x5ff   : > { %1594 = vmatprep.mubr.bf16.mxu1 %v2582_v40 }
 0x68e   : > { %v964_v13 = vpop.f32.mrb[8].mxu1 }
 0x68f   : > { %v2299_v14 = vpop.f32.mrb[9].mxu1 }
 0x690   : > { %v967_v16 = vpop.f32.mrb[10].mxu1 }
 0x691   : > { %v2300_v17 = vpop.f32.mrb[11].mxu1 }
 0x6c1   : > { %v1087_v21 = vpop.f32.mrb[12].mxu1 }
 0x6c2   : > { %v2311_v22 = vpop.f32.mrb[13].mxu1 }
 0x6c3   : > { %v1090_v25 = vpop.f32.mrb[14].mxu1  ;;  %v2456_v22 = vld [vmem:[%s2726_s20] ss:$8 sps:$4 sm:$0xff]  }
 0x6c4   : > { %v2425_v24 = vpack.i.bf16 %v1090_v25, %v1087_v21  ;;  %v2312_v26 = vpop.f32.mrb[15].mxu1  ;;  %v2458_v21 = vld [vmem:[%s2726_s20 + $0x4] ss:$8 sps:$4 sm:$0xff]   ;;  %v2459_v25 = vld [vmem:[%s2726_s20 + $0x10] ss:$8 sps:$4 sm:$0xff]  }
 0x6c5   : > { %1562 = vmatprep.subr.bf16.mxu1 %v2458_v21  ;;  %v2462_v26 = vld [vmem:[%s2726_s20 + $0x20] ss:$8 sps:$4 sm:$0xff]  }
 0x6c6   : > { %2426 = vrot.lane.b32.xlu1 %v2425_v24, %s2591_s30  ;;  %1563 = vmatpush1.bf16.msra.mxu1 %v2456_v22  ;;  %v2464_v24 = vld [vmem:[%s2726_s20 + $0x24] ss:$8 sps:$4 sm:$0xff]  }
 0x6c7   : > { %1564 = vmatprep.subr.bf16.mxu1 %v2461_v23 }
 0x6c9   : > { %v1208_v40 = vpop.f32.mrb[16].mxu1 }
 0x6ca   : > { %v2323_v28 = vpop.f32.mrb[17].mxu1  ;;  %1565 = vmatpush1.bf16.msra.mxu1 %v2459_v25 }
 0x6cb   : > { %v1211_v30 = vpop.f32.mrb[18].mxu1  ;;  %1566 = vmatprep.subr.bf16.mxu1 %v2464_v24 }
 0x6cc   : > { %v2430_v32 = vpack.i.bf16 %v1211_v30, %v1208_v40  ;;  %v2324_v33 = vpop.f32.mrb[19].mxu1  ;;  %v2467_v40 = vld [vmem:[%s2726_s20 + $0x34] ss:$8 sps:$4 sm:$0xff]  }
 0x6ce   : > { %2431 = vrot.lane.b32.xlu1 %v2430_v32, %s2590_s22  ;;  %1567 = vmatpush1.bf16.msra.mxu1 %v2462_v26 }
 0x6cf   : > { %1568 = vmatprep.subr.bf16.mxu1 %v2467_v40 }
 0x6d1   : > { %v1329_v34 = vpop.f32.mrb[20].mxu1 }
 0x6d2   : > { %v2335_v35 = vpop.f32.mrb[21].mxu1  ;;  %1569 = vmatpush1.bf16.msra.mxu1 %v2465_v27 }
 0x6d3   : > { %v1332_v36 = vpop.f32.mrb[22].mxu1  ;;  %v1488_v35 = vsub.s32 4, %v2796_v48 }
 0x6d4   : > { %v2435_v37 = vpack.i.bf16 %v1332_v36, %v1329_v34  ;;  %v2336_v31 = vpop.f32.mrb[23].mxu1 }
 0x6d6   : > { %2436 = vrot.lane.b32.xlu0 %v2435_v37, %s2585_s10  ;;  %v1489_v37 = vrot.slane %v2802_v50, %v1488_v35  ;;  %v2468_v50 = vld [vmem:[%s2731_s3 + $0x40] sm:$0xff]  }
 0x6d7   : > { %2242 = vmatprep.subr.bf16.mxu0 %v2468_v50 }
 0x738   : > { %v2427_v38 = vpop.permute.xlu1 %2426 }
 0x739   : > { %v2429_v41 = vunpack.i.h.bf16 %v2427_v38  ;;  %v2428_v42 = vunpack.i.l.bf16 %v2427_v38  ;;  %v1494_v38 = vsub.s32 3, %v2796_v48 }
 0x73b   : > { %v1361_v45 = vsel %vm856_vm4, %v967_v16, %v2429_v41  ;;  %v1360_v46 = vsel %vm856_vm4, %v964_v13, %v2428_v42 }
 0x740   : > { %v2432_v39 = vpop.permute.xlu1 %2431 }
 0x741   : > { %v2434_v1 = vunpack.i.h.bf16 %v2432_v39  ;;  %v2433_v43 = vunpack.i.l.bf16 %v2432_v39 }
 0x743   : > { %v1364_v53 = vsel %vm1362_vm5, %v1361_v45, %v2434_v1  ;;  %v1363_v15 = vsel %vm1362_vm5, %v1360_v46, %v2433_v43  ;;  %v1495_v1 = vrot.slane %v2799_v49, %v1494_v38 }
 0x748   : > { %v2437_v44 = vpop.permute.xlu0 %2436 }
 0x749   : > { %v2439_v47 = vunpack.i.h.bf16 %v2437_v44  ;;  %v2438_v52 = vunpack.i.l.bf16 %v2437_v44 }
 0x74b   : > { %v1367_v54 = vsel %vm1365_vm6, %v1364_v53, %v2439_v47  ;;  %v1366_v56 = vsel %vm1365_vm6, %v1363_v15, %v2438_v52  ;;  %v2469_v47 = vld [vmem:[%s2731_s3] sm:$0xff]   ;;  %v2470_v52 = vld [vmem:[%s2731_s3 + $0x48] sm:$0xff]   ;;  %v2472_v15 = vld [vmem:[%s2731_s3 + $0x50] sm:$0xff]  }
 0x74c   : > { %v1368_v57 = vpack.c.bf16 %v1367_v54, %v1366_v56  ;;  %v2471_v53 = vld [vmem:[%s2731_s3 + $0x8] sm:$0xff]   ;;  %v2473_v54 = vld [vmem:[%s2731_s3 + $0x10] sm:$0xff]   ;;  %v2474_v56 = vld [vmem:[%s2731_s3 + $0x58] sm:$0xff]  }
 0x74e   : > { %2346 = vmatmul.mubr.msk.bf16.vlgmr.msra.gmra.mrb[12].mxu0 %vm700_vm2, %v1368_v57  ;;  %v2475_v57 = vld [vmem:[%s2731_s3 + $0x18] sm:$0xff]  }
 0x74f   : > { %2243 = vmatpush3.bf16.msra.mxu0 %v2469_v47 }
 0x750   : > { %2244 = vmatprep.subr.bf16.mxu0 %v2470_v52 }
 0x753   : > { %2245 = vmatpush3.bf16.msra.mxu0 %v2471_v53 }
 0x754   : > { %2246 = vmatprep.subr.bf16.mxu0 %v2472_v15 }
 0x757   : > { %2247 = vmatpush3.bf16.msra.mxu0 %v2473_v54 }
 0x758   : > { %2248 = vmatprep.subr.bf16.mxu0 %v2474_v56  ;;  %v1821_v56 = vsub.s32 5, %v2796_v48 }
 0x75b   : > { %2249 = vmatpush3.bf16.msra.mxu0 %v2475_v57 }
 0x75c   : > { %2250 = vmatprep.subr.bf16.mxu0 %v2476_v58  ;;  %v2180_v58 = vld [vmem:[%s2736_s4 + $0x5] ss:$0 sm:$0xff] }
 0x821   : > { %v1445_v61 = vpop.f32.mrb[12].mxu0 }
 0x822   : > { %v1446_v62 = vadd.f32 %v2165_v59, %v1445_v61  ;;  %v2347_v63 = vpop.f32.mrb[13].mxu0  ;;  %v2479_v61 = vld [vmem:[%s2731_s3 + $0x28] sm:$0xff]  }
 0x823   : > { %v1448_v0 = vpop.f32.mrb[14].mxu0  ;;  %v2481_v63 = vld [vmem:[%s2731_s3 + $0x30] sm:$0xff]  }
 0x824   : > { %v1456_v2 = vmul.f32 %v1455_v60, %v1446_v62  ;;  %v1449_v3 = vadd.f32 %v2165_v59, %v1448_v0  ;;  %v2348_v4 = vpop.f32.mrb[15].mxu0  ;;  %v2477_v59 = vld [vmem:[%s2731_s3 + $0x20] sm:$0xff]   ;;  %v2480_v62 = vld [vmem:[%s2731_s3 + $0x70] sm:$0xff]   ;;  %v2482_v0 = vld [vmem:[%s2731_s3 + $0x78] sm:$0xff]  }
 0x825   : > { %2251 = vmatpush3.bf16.msra.mxu0 %v2477_v59 }
 0x826   : > { %v2918_v5 = vadd.f32 %v1456_v2, %v2775_v18  ;;  %v1457_v6 = vmul.f32 %v1455_v60, %v1449_v3  ;;  %v2478_v60 = vld [vmem:[%s2731_s3 + $0x68] sm:$0xff]   ;;  %v2483_v2 = vld [vmem:[%s2731_s3 + $0x38] sm:$0xff]   ;;  %v1507_v3 = vld [vmem:[%s2736_s4 + $0x3] sm:$0x3] }
 0x827   : > { %2252 = vmatprep.subr.bf16.mxu0 %v2478_v60  ;;  %v1512_v4 = vrot.slane %v1507_v3, %v2810_v55 }
 0x828   : > { %v2921_v7 = vadd.f32 %v1457_v6, %v2777_v19  ;;  %v1460_v8 = vsel %vm700_vm2, %v2918_v5, 0.0  ;;  %v1516_v6 = vrot.slane %v1507_v3, %v2805_v51 }
 0x829   : > { %1461 = vadd.xlane.f32.xlu1 %v1460_v8  ;;  %2253 = vmatpush3.bf16.msra.mxu0 %v2479_v61  ;;  %v1822_v61 = vrot.slane %v2799_v49, %v1821_v56 }
 0x82a   : > { %v1463_v9 = vsel %vm700_vm2, %v2921_v7, 0.0  ;;  %2254 = vmatprep.subr.bf16.mxu0 %v2480_v62 }
 0x82b   : > { %1464 = vadd.xlane.f32.xlu0 %v1463_v9 }
 0x82d   : > { %2255 = vmatpush3.bf16.msra.mxu0 %v2481_v63 }
 0x82e   : > { %2256 = vmatprep.subr.bf16.mxu0 %v2482_v0 }
 0x831   : > { %2257 = vmatpush3.bf16.msra.mxu0 %v2483_v2 }
 0x8b6   : > { %v1462_v10 = vpop.xlane.xlu1 %1461 }
 0x8b7   : > { %v1466_v11 = vmul.f32 0.015625, %v1462_v10 }
 0x8b8   : > { %v1465_v18 = vpop.xlane.xlu0 %1464 }
 0x8b9   : > { %v1468_v12 = vsub.f32 %v2918_v5, %v1466_v11  ;;  %v1467_v13 = vmul.f32 0.015625, %v1465_v18 }
 0x8bb   : > { %v1469_v19 = vsub.f32 %v2921_v7, %v1467_v13  ;;  %v1470_v14 = vmul.f32 %v1468_v12, %v1468_v12 }
 0x8bd   : > { %v1472_v16 = vsel %vm700_vm2, %v1470_v14, 0.0  ;;  %v1471_v17 = vmul.f32 %v1469_v19, %v1469_v19 }
 0x8be   : > { %1473 = vadd.xlane.f32.xlu0 %v1472_v16 }
 0x8bf   : > { %v1475_v20 = vsel %vm700_vm2, %v1471_v17, 0.0 }
 0x8c2   : > { %1476 = vadd.xlane.f32.xlu0 %v1475_v20 }
 0x94b   : > { %v1474_v28 = vpop.xlane.xlu0 %1473 }
 0x94c   : > { %v1478_v29 = vmul.f32 0.015625, %v1474_v28 }
 0x94e   : > { %v1480_v30 = vadd.f32 1e-06, %v1478_v29 }
 0x94f   : > { %v1477_v32 = vpop.xlane.xlu0 %1476 }
 0x950   : > { %2520 = vrsqrt.f32 %v1480_v30  ;;  %v1479_v33 = vmul.f32 0.015625, %v1477_v32 }
 0x952   : > { %v1481_v34 = vadd.f32 1e-06, %v1479_v33 }
 0x954   : > { %2522 = vrsqrt.f32 %v1481_v34 }
 0x95a   : > { %v2521_v36 = vpop.eup %2520 }
 0x95b   : > { %v1484_v31 = vmul.f32 %v2521_v36, %v1468_v12 }
 0x95d   : > { %v1490_v41 = vmul.f32 %v1489_v37, %v1484_v31 }
 0x95e   : > { %v2523_v39 = vpop.eup %2522 }
 0x95f   : > { %v1485_v42 = vmul.f32 %v2523_v39, %v1469_v19  ;;  %v1496_v44 = vadd.f32 %v1495_v1, %v1490_v41 }
 0x961   : > { %v1491_v43 = vmul.f32 %v1489_v37, %v1485_v42 }
 0x963   : > { %v1497_v45 = vadd.f32 %v1495_v1, %v1491_v43 }
 0x965   : > { %v1498_v46 = vpack.c.bf16 %v1497_v45, %v1496_v44 }
 0x967   : > { %2179 = vmatmul.mubr.msk.bf16.vlgmr.msra.gmra.mrb[24].mxu1 %vm700_vm2, %v1498_v46 }
 0xa3a   : > { %v1596_v8 = vpop.f32.mrb[24].mxu1 }
 0xa3b   : > { %v1597_v9 = vadd.f32 %v1596_v8, %v1512_v4  ;;  %v1598_v10 = vpop.f32.mrb[25].mxu1 }
 0xa3c   : > { %v1599_v11 = vadd.f32 %v1598_v10, %v1516_v6  ;;  %v1600_v18 = vpop.f32.mrb[26].mxu1 }
 0xa3d   : > { %v1609_v12 = vmul.f32 0.044715, %v1597_v9  ;;  %v1601_v13 = vadd.f32 %v1600_v18, %v1512_v4  ;;  %v1602_v19 = vpop.f32.mrb[27].mxu1  ;;  %v1605_v42 = vmul.f32 0.5, %v1597_v9 }
 0xa3e   : > { %v1610_v14 = vmul.f32 0.044715, %v1599_v11  ;;  %v1603_v16 = vadd.f32 %v1602_v19, %v1516_v6  ;;  %v1606_v44 = vmul.f32 0.5, %v1599_v11 }
 0xa3f   : > { %v1613_v17 = vmul.f32 %v1609_v12, %v1597_v9  ;;  %v1611_v20 = vmul.f32 0.044715, %v1601_v13  ;;  %v1607_v1 = vmul.f32 0.5, %v1601_v13 }
 0xa40   : > { %v1614_v21 = vmul.f32 %v1610_v14, %v1599_v11  ;;  %v1612_v22 = vmul.f32 0.044715, %v1603_v16  ;;  %v1608_v45 = vmul.f32 0.5, %v1603_v16 }
 0xa41   : > { %v1617_v23 = vmul.f32 %v1613_v17, %v1597_v9  ;;  %v1615_v25 = vmul.f32 %v1611_v20, %v1601_v13  ;;  %v2532_v17 = vld [vmem:[%s3041_s21] sm:$0xff] (!%p2197_p9)   ;;  %v2592_v20 = vmov (!%p2197_p9), 0.0  }
 0xa42   : > { %v1618_v24 = vmul.f32 %v1614_v21, %v1599_v11  ;;  %v1616_v26 = vmul.f32 %v1612_v22, %v1603_v16  ;;  %2349 = vmatprep.subr.bf16.mxu0 (!%p2197_p9), %v2592_v20  ;;  %v2533_v21 = vld [vmem:[%s3042_s17 + $0x8] sm:$0xff] (!%p2197_p9)   ;;  %v2534_v22 = vld [vmem:[%s3042_s17 + $0x10] sm:$0xff] (!%p2197_p9)  }
 0xa43   : > { %v1621_v27 = vadd.f32 %v1617_v23, %v1597_v9  ;;  %v1619_v51 = vmul.f32 %v1615_v25, %v1601_v13  ;;  %v2535_v23 = vld [vmem:[%s3042_s17 + $0x18] sm:$0xff] (!%p2197_p9)  }
 0xa44   : > { %v1620_v40 = vmul.f32 %v1616_v26, %v1603_v16  ;;  %v1622_v28 = vadd.f32 %v1618_v24, %v1599_v11 }
 0xa45   : > { %v1625_v29 = vmul.f32 0.7978845, %v1621_v27  ;;  %v1623_v30 = vadd.f32 %v1619_v51, %v1601_v13 }
 0xa46   : > { %v1624_v32 = vadd.f32 %v1620_v40, %v1603_v16  ;;  %v1626_v33 = vmul.f32 0.7978845, %v1622_v28  ;;  %v1833_v28 = vld [vmem:[%s2706_s27] sm:$0x1] (!%p2197_p9) }
 0xa47   : > { %2524 = vtanh.f32 %v1625_v29  ;;  %v1627_v34 = vmul.f32 0.7978845, %v1623_v30  ;;  %v1861_v29 = vadd.f32 (!%p2197_p9), 1.0, %v1833_v28 }
 0xa48   : > { %v1628_v35 = vmul.f32 0.7978845, %v1624_v32  ;;  %2526 = vtanh.f32 %v1626_v33 }
 0xa49   : > { %2528 = vtanh.f32 %v1627_v34  ;;  %v1865_v33 = vrot.slane (!%p2197_p9), %v1861_v29, %v2810_v55 }
 0xa4a   : > { %2530 = vtanh.f32 %v1628_v35 }
 0xa51   : > { %v2525_v36 = vpop.eup %2524 }
 0xa52   : > { %v2527_v37 = vpop.eup %2526  ;;  %v1633_v31 = vadd.f32 1.0, %v2525_v36 }
 0xa53   : > { %v2529_v38 = vpop.eup %2528  ;;  %v1634_v39 = vadd.f32 1.0, %v2527_v37  ;;  %v2198_v37 = vld [vmem:[%s2706_s27 + $0x1] ss:$0 sm:$0xff] (!%p2197_p9) }
 0xa54   : > { %v2531_v41 = vpop.eup %2530  ;;  %v1635_v43 = vadd.f32 1.0, %v2529_v38  ;;  %v1637_v50 = vmul.f32 %v1633_v31, %v1605_v42  ;;  %v2199_v42 = vld [vmem:[%s3043_s24] ss:$0 sm:$0xff] (!%p2197_p9) }
 0xa55   : > { %v1636_v46 = vadd.f32 1.0, %v2531_v41  ;;  %v1638_v52 = vmul.f32 %v1634_v39, %v1606_v44 }
 0xa56   : > { %v1639_v47 = vmul.f32 %v1635_v43, %v1607_v1 }
 0xa57   : > { %v1640_v53 = vmul.f32 %v1636_v46, %v1608_v45 }
 0xa58   : > { %v1641_v15 = vpack.c.bf16 %v1639_v47, %v1637_v50 }
 0xa59   : > { %v1642_v54 = vpack.c.bf16 %v1640_v53, %v1638_v52 }
 0xa5b   : > { %1810 = vmatprep.mubr.bf16.mxu0 %v1642_v54 }
 0xa5c   : > { %1811 = vmatmul.mubr.bf16.vlgmr.msra.gmra.mrb[16].mxu0 %v1641_v15 }
 0xa5d   : > { %2357 = vmatprep.mubr.msk.bf16.mxu0 (!%p2197_p9), %vm2593_vm7, %v2592_v20  ;;  %2350 = vmatpush3.bf16.msra.mxu0 (!%p2197_p9), %v2532_v17 }
 0xa5e   : > { %2351 = vmatprep.subr.bf16.mxu0 (!%p2197_p9), %v2592_v20 }
 0xa61   : > { %2352 = vmatpush3.bf16.msra.mxu0 (!%p2197_p9), %v2533_v21 }
 0xa62   : > { %2353 = vmatprep.subr.bf16.mxu0 (!%p2197_p9), %v2592_v20 }
 0xa65   : > { %2354 = vmatpush3.bf16.msra.mxu0 (!%p2197_p9), %v2534_v22 }
 0xa66   : > { %2355 = vmatprep.subr.bf16.mxu0 (!%p2197_p9), %v2592_v20 }
 0xa69   : > { %2356 = vmatpush3.bf16.msra.mxu0 (!%p2197_p9), %v2535_v23 }
 0xb2f   : > { %v2258_v57 = vpop.f32.mrb[16].mxu0 }
 0xb30   : > { %v2259_v59 = vpop.f32.mrb[17].mxu0 }
 0xb31   : > { %v2260_v60 = vadd.f32 %v2259_v59, %v2258_v57  ;;  %v2261_v62 = vpop.f32.mrb[18].mxu0 }
 0xb32   : > { %v2262_v63 = vpop.f32.mrb[19].mxu0 }
 0xb33   : > { %v1813_v0 = vadd.f32 %v2260_v60, %v2180_v58  ;;  %v2263_v2 = vadd.f32 %v2262_v63, %v2261_v62 }
 0xb35   : > { %v1823_v3 = vmul.f32 %v1822_v61, %v1813_v0  ;;  %v1816_v4 = vadd.f32 %v2263_v2, %v2180_v58  ;;  %1832 = sbr.rel (%p2197_p9) target bundleno = 3409 (0xd51), region = 76 }
 0xb37   : > { %v1825_v6 = vadd.f32 %v1823_v3, %v2918_v5  ;;  %v1824_v8 = vmul.f32 %v1822_v61, %v1816_v4 }
 0xb39   : > { %1827 = vst.msk [vmem:[#allocation2] sm:$0xff] %vm700_vm2, %v1825_v6  ;;  %v1826_v9 = vadd.f32 %v1824_v8, %v2921_v7  ;;  %v1835_v48 = vsel (!%p2197_p9), %vm700_vm2, %v1825_v6, 0.0 }
 0xb3a   : > { %1836 = vadd.xlane.f32.xlu0 (!%p2197_p9), %v1835_v48 }
 0xb3b   : > { %1828 = vst.msk [vmem:[#allocation2 + $0x8] sm:$0xff] %vm700_vm2, %v1826_v9  ;;  %v1838_v49 = vsel (!%p2197_p9), %vm700_vm2, %v1826_v9, 0.0 }
 0xb3e   : > { %1839 = vadd.xlane.f32.xlu0 %v1838_v49 }
 0xbc7   : > { %v1837_v10 = vpop.xlane.xlu0 %1836 }
 0xbc8   : > { %v1841_v11 = vmul.f32 0.015625, %v1837_v10 }
 0xbca   : > { %v1843_v18 = vsub.f32 %v1825_v6, %v1841_v11 }
 0xbcb   : > { %v1840_v5 = vpop.xlane.xlu0 %1839 }
 0xbcc   : > { %v1842_v12 = vmul.f32 0.015625, %v1840_v5  ;;  %v1845_v13 = vmul.f32 %v1843_v18, %v1843_v18 }
 0xbce   : > { %v1844_v19 = vsub.f32 %v1826_v9, %v1842_v12  ;;  %v1847_v7 = vsel %vm700_vm2, %v1845_v13, 0.0 }
 0xbcf   : > { %1848 = vadd.xlane.f32.xlu1 %v1847_v7 }
 0xbd0   : > { %v1846_v14 = vmul.f32 %v1844_v19, %v1844_v19 }
 0xbd2   : > { %v1850_v16 = vsel %vm700_vm2, %v1846_v14, 0.0 }
 0xbd3   : > { %1851 = vadd.xlane.f32.xlu1 %v1850_v16 }
 0xc5c   : > { %v1849_v25 = vpop.xlane.xlu1 %1848 }
 0xc5d   : > { %v1853_v24 = vmul.f32 0.015625, %v1849_v25 }
 0xc5f   : > { %v1855_v26 = vadd.f32 1e-06, %v1853_v24 }
 0xc60   : > { %v1852_v27 = vpop.xlane.xlu1 %1851 }
 0xc61   : > { %2536 = vrsqrt.f32 %v1855_v26  ;;  %v1854_v51 = vmul.f32 0.015625, %v1852_v27 }
 0xc63   : > { %v1856_v40 = vadd.f32 1e-06, %v1854_v51 }
 0xc65   : > { %2538 = vrsqrt.f32 %v1856_v40 }
 0xc6b   : > { %v2537_v30 = vpop.eup %2536 }
 0xc6c   : > { %v1859_v32 = vmul.f32 %v2537_v30, %v1843_v18 }
 0xc6e   : > { %v1866_v36 = vmul.f32 %v1865_v33, %v1859_v32 }
 0xc6f   : > { %v2539_v34 = vpop.eup %2538 }
 0xc70   : > { %v1860_v35 = vmul.f32 %v2539_v34, %v1844_v19  ;;  %v1872_v38 = vadd.f32 %v2198_v37, %v1866_v36 }
 0xc72   : > { %v1867_v31 = vmul.f32 %v1865_v33, %v1860_v35 }
 0xc74   : > { %v1873_v39 = vadd.f32 %v2198_v37, %v1867_v31 }
 0xc76   : > { %v1874_v41 = vpack.c.bf16 %v1873_v39, %v1872_v38 }
 0xc78   : > { %2358 = vmatmul.mubr.msk.bf16.vlgmr.msra.gmra.mrb[0].mxu0 %vm700_vm2, %v1874_v41 }
 0xd4b   : > { %v1951_v1 = vpop.f32.mrb[0].mxu0 }
 0xd4c   : > { %v1952_v43 = vadd.f32 %v2199_v42, %v1951_v1  ;;  %v2359_v44 = vpop.f32.mrb[1].mxu0 }
 0xd4d   : > { %v1954_v45 = vpop.f32.mrb[2].mxu0 }
 0xd4e   : > { %1958 = vst [vmem:[%s2741_s25] sm:$0xff] %v1952_v43  ;;  %v1955_v55 = vadd.f32 %v2199_v42, %v1954_v45  ;;  %v2360_v46 = vpop.f32.mrb[3].mxu0 }
 0xd50   : > { %1959 = vst [vmem:[%s2741_s25 + $0x8] sm:$0xff] %v1955_v55 }
 0xd51 PF: > { %s3044_s27 = sld [smem:[#allocation5_spill]]  ;;  %s3045_s21 = sld [smem:[#allocation3_spill]] }
 0xd52   : > { %s3046_s22 = sld [smem:[#allocation4_spill]]  ;;  %s3047_s23 = sld [smem:[#allocation6_spill]] }
 0xd53   : > { %s3048_s24 = sld [smem:[#allocation7_spill]] }
 0xd57   : > { %s22_s25 = sadd.s32 1, %s3044_s27  }
 0xd58   : > { %p19_p10 = scmp.ge.s32.totalorder %s22_s25, 6  }
 0xd5a   :  { %21 = sbr.rel (!%p19_p10) target bundleno = 6 (0x6), region = 127 }

</bundles_post_ra>
